<compile_context>
chip_gen: v5e
topology: v5e:2x2
jax: 0.10.0
libtpu: 0.0.40
codegen_flags: <defaults>
</compile_context>

<pallas_src>
import functools

import jax
import jax.numpy as jnp
from jax.experimental import pallas as pl
from jax.experimental.pallas import tpu as pltpu


# ----------------------------------------------------------------------------- #
# Tile-size selection helpers (all static Python, no runtime cost)
# ----------------------------------------------------------------------------- #
def _round_up(x, m):
    return ((x + m - 1) // m) * m


def _pick_tm(M, cap=512):
    """Return (Mp, tm): padded row count (mult of 8) and a tile that divides it."""
    Mp = _round_up(M, 8)
    if Mp <= cap:
        return Mp, Mp
    for tm in (512, 256, 128, 64, 32, 16, 8):
        if tm <= cap and Mp % tm == 0:
            return Mp, tm
    return Mp, 8


def _pick_tk(K):
    """Whole K when it fits one block (every GEMM here), else a 128-mult divisor."""
    if K <= 4608:
        return K
    for tk in (2048, 1024, 512, 256, 128):
        if K % tk == 0:
            return tk
    return K


def _pick_tn(N):
    """N tile: full when <=256 (no padding), else 256/128 so megacore gets >=2 blocks."""
    if N <= 256:
        return N
    for tn in (256, 128):
        if N % tn == 0:
            return tn
    return N


# ----------------------------------------------------------------------------- #
# Pallas kernels
# ----------------------------------------------------------------------------- #
def _matmul_epilogue_kernel(a_ref, b_ref, c_ref, *rest, relu, has_res):
    """Single-K fast path: out = [relu]( A@B + bias [+ residual] ), no scratch."""
    if has_res:
        r_ref, o_ref = rest
    else:
        (o_ref,) = rest
    y = jnp.dot(a_ref[...], b_ref[...], preferred_element_type=jnp.float32)
    y = y + c_ref[...]
    if has_res:
        y = y + r_ref[...].astype(jnp.float32)
    if relu:
        y = jnp.maximum(y, 0.0)
    o_ref[...] = y.astype(o_ref.dtype)


def _matmul_acc_kernel(a_ref, b_ref, c_ref, *rest, relu, has_res):
    """Multi-K path: f32 accumulation in VMEM scratch, fused epilogue on last K step."""
    if has_res:
        r_ref, o_ref, acc_ref = rest
    else:
        o_ref, acc_ref = rest

    @pl.when(pl.program_id(2) == 0)
    def _():
        acc_ref[...] = jnp.zeros_like(acc_ref)

    acc_ref[...] += jnp.dot(a_ref[...], b_ref[...],
                            preferred_element_type=jnp.float32)

    @pl.when(pl.program_id(2) == pl.num_programs(2) - 1)
    def _():
        y = acc_ref[...] + c_ref[...]
        if has_res:
            y = y + r_ref[...].astype(jnp.float32)
        if relu:
            y = jnp.maximum(y, 0.0)
        o_ref[...] = y.astype(o_ref.dtype)


def _conv3x3_kernel(x_ref, w_ref, b_ref, o_ref, *, wq, mq, c, relu):
    """Implicit-GEMM 3x3/s1 conv on one image: 9 contiguous tap windows of the
    flattened padded slab, accumulated in f32, bias/ReLU fused."""
    acc = None
    for t in range(9):
        i, j = divmod(t, 3)
        a = x_ref[pl.ds(i * wq + j, mq), :]          # (Mq, C) contiguous tap window
        wt = w_ref[pl.ds(t * c, c), :]                # (C, tn) tap weight block
        d = jnp.dot(a, wt, preferred_element_type=jnp.float32)
        acc = d if acc is None else acc + d
    y = acc + b_ref[...]
    if relu:
        y = jnp.maximum(y, 0.0)
    o_ref[...] = y.astype(o_ref.dtype)


def _max9_kernel(*refs):
    """Elementwise max over 9 input tiles (3x3 max-pool taps)."""
    o_ref = refs[-1]
    m = refs[0][...]
    for r in refs[1:-1]:
        m = jnp.maximum(m, r[...])
    o_ref[...] = m


# ----------------------------------------------------------------------------- #
# GEMM wrapper (bias/residual/ReLU fused; BN scale already folded into weights)
# ----------------------------------------------------------------------------- #
def fused_matmul(a, b, bias, residual=None, relu=False,
                 out_dtype=jnp.bfloat16, cap_m=512):
    """(M,K) @ (K,N) with bias / ReLU / f32 residual fused into the epilogue."""
    M, K = a.shape
    Kb, N = b.shape
    assert K == Kb
    Mp, tm = _pick_tm(M, cap_m)
    tn = _pick_tn(N)
    tk = _pick_tk(K)
    nk = K // tk

    # v7x: make sure both TensorCores get at least one parallel block when possible.
    if (Mp // tm) * (N // tn) < 2 and tm == Mp and Mp % 16 == 0:
        tm = Mp // 2

    if Mp != M:
        a = jnp.pad(a, ((0, Mp - M), (0, 0)))
        if residual is not None:
            residual = jnp.pad(residual, ((0, Mp - M), (0, 0)))

    a = a.astype(jnp.bfloat16)
    b = b.astype(jnp.bfloat16)
    bias = bias.astype(jnp.float32)
    has_res = residual is not None
    if has_res:
        residual = residual.astype(jnp.float32)   # f32 residual add (matches reference)

    if nk == 1:
        in_specs = [
            pl.BlockSpec((tm, K), lambda i, j: (i, 0)),
            pl.BlockSpec((K, tn), lambda i, j: (0, j)),
            pl.BlockSpec((1, tn), lambda i, j: (0, j)),
        ]
        operands = [a, b, bias]
        if has_res:
            in_specs.append(pl.BlockSpec((tm, tn), lambda i, j: (i, j)))
            operands.append(residual)
        out = pl.pallas_call(
            functools.partial(_matmul_epilogue_kernel, relu=relu, has_res=has_res),
            out_shape=jax.ShapeDtypeStruct((Mp, N), out_dtype),
            grid_spec=pltpu.PrefetchScalarGridSpec(
                num_scalar_prefetch=0,
                grid=(Mp // tm, N // tn),
                in_specs=in_specs,
                out_specs=pl.BlockSpec((tm, tn), lambda i, j: (i, j))),
            compiler_params=pltpu.CompilerParams(
                dimension_semantics=("parallel", "parallel")),
        )(*operands)
    else:
        in_specs = [
            pl.BlockSpec((tm, tk), lambda i, j, k: (i, k)),
            pl.BlockSpec((tk, tn), lambda i, j, k: (k, j)),
            pl.BlockSpec((1, tn), lambda i, j, k: (0, j)),
        ]
        operands = [a, b, bias]
        if has_res:
            in_specs.append(pl.BlockSpec((tm, tn), lambda i, j, k: (i, j)))
            operands.append(residual)
        out = pl.pallas_call(
            functools.partial(_matmul_acc_kernel, relu=relu, has_res=has_res),
            out_shape=jax.ShapeDtypeStruct((Mp, N), out_dtype),
            grid_spec=pltpu.PrefetchScalarGridSpec(
                num_scalar_prefetch=0,
                grid=(Mp // tm, N // tn, nk),
                in_specs=in_specs,
                out_specs=pl.BlockSpec((tm, tn), lambda i, j, k: (i, j)),
                scratch_shapes=[pltpu.VMEM((tm, tn), jnp.float32)]),
            compiler_params=pltpu.CompilerParams(
                dimension_semantics=("parallel", "parallel", "arbitrary")),
        )(*operands)

    if Mp != M:
        out = out[:M]
    return out


# ----------------------------------------------------------------------------- #
# Convolutions / pooling wrappers
# ----------------------------------------------------------------------------- #
def im2col(x, kh, kw, stride, pad):
    """x: NHWC -> patches (N*Ho*Wo, kh*kw*C), plus N, Ho, Wo (stride-2 / stem only)."""
    N, H, W, C = x.shape
    if pad > 0:
        x = jnp.pad(x, ((0, 0), (pad, pad), (pad, pad), (0, 0)))
    Ho = (H + 2 * pad - kh) // stride + 1
    Wo = (W + 2 * pad - kw) // stride + 1
    if kh == 1 and kw == 1:
        p = x[:, ::stride, ::stride, :]
        return p.reshape(N * Ho * Wo, C), N, Ho, Wo
    cols = []
    for i in range(kh):
        for j in range(kw):
            cols.append(x[:, i:i + stride * Ho:stride, j:j + stride * Wo:stride, :])
    patches = jnp.concatenate(cols, axis=-1)  # ordering matches HWIO weight reshape
    return patches.reshape(N * Ho * Wo, kh * kw * C), N, Ho, Wo


def conv3x3_s1(x, wp, relu=True):
    """Implicit-GEMM 3x3 stride-1 pad-1 conv with folded-BN bias + ReLU.

    Padded NHWC activation is flattened per image to (Hp*Wq, C); with stride 1
    every tap is a contiguous row window of that slab, so the kernel slices it
    in VMEM (no HBM im2col).  Phantom columns from the W padding are computed
    and sliced off afterwards (extra rows = 2/Wq of the work).
    """
    N, H, W, C = x.shape
    Ho, Wo = H, W
    Wq = Wo + 2
    Hp = Ho + 3            # 1 top + 2 bottom pad rows keep every tap window in-bounds
    Mq = Ho * Wq
    Cout = wp["w"].shape[1]
    tn = _pick_tn(Cout)

    xp = jnp.pad(x.astype(jnp.bfloat16),
                 ((0, 0), (1, 2), (1, 1), (0, 0))).reshape(N, Hp * Wq, C)

    out = pl.pallas_call(
        functools.partial(_conv3x3_kernel, wq=Wq, mq=Mq, c=C, relu=relu),
        out_shape=jax.ShapeDtypeStruct((N, Mq, Cout), jnp.bfloat16),
        grid_spec=pltpu.PrefetchScalarGridSpec(
            num_scalar_prefetch=0,
            grid=(N, Cout // tn),
            in_specs=[
                pl.BlockSpec((pl.Squeezed(), Hp * Wq, C), lambda n, j: (n, 0, 0)),
                pl.BlockSpec((9 * C, tn), lambda n, j: (0, j)),
                pl.BlockSpec((1, tn), lambda n, j: (0, j)),
            ],
            out_specs=pl.BlockSpec((pl.Squeezed(), Mq, tn), lambda n, j: (n, 0, j))),
        compiler_params=pltpu.CompilerParams(
            dimension_semantics=("parallel", "parallel")),
    )(xp, wp["w"], wp["b"])

    return out.reshape(N, Ho, Wq, Cout)[:, :, :Wo, :]


def conv_bn(x, wp, stride, pad, relu=True, residual=None):
    """Conv + (folded) BN bias + optional residual/ReLU.

    Stride-1 3x3 convs take the implicit-GEMM path; 1x1 convs, stride-2 3x3
    convs and the 7x7 stem use im2col + the fused matmul.
    """
    kh, kw = wp["kh"], wp["kw"]
    if kh == 3 and kw == 3 and stride == 1 and pad == 1 and residual is None:
        return conv3x3_s1(x, wp, relu=relu)
    patches, N, Ho, Wo = im2col(x, kh, kw, stride, pad)
    if wp["kpad"] > patches.shape[1]:
        patches = jnp.pad(patches, ((0, 0), (0, wp["kpad"] - patches.shape[1])))
    y = fused_matmul(patches, wp["w"], wp["b"], residual=residual, relu=relu)
    return y.reshape(N, Ho, Wo, -1)


def maxpool3x3s2(x):
    N, H, W, C = x.shape
    xp = jnp.pad(x, ((0, 0), (1, 1), (1, 1), (0, 0)),
                 constant_values=jnp.array(-jnp.inf, x.dtype))
    Ho = (H + 2 - 3) // 2 + 1
    Wo = (W + 2 - 3) // 2 + 1
    M = N * Ho * Wo
    taps = [xp[:, i:i + 2 * Ho:2, j:j + 2 * Wo:2, :].reshape(M, C)
            for i in range(3) for j in range(3)]

    # Lane-densify: fold rows into lanes so stores are unmasked full-width vst.
    R, Cd = M, C
    if C < 128 and (M * C) % 128 == 0:
        R, Cd = (M * C) // 128, 128
        taps = [t.reshape(R, Cd) for t in taps]

    Rp, bm = _pick_tm(R, cap=512)
    if (Rp // bm) < 2 and bm == Rp and Rp % 16 == 0:
        bm = Rp // 2                     # give both v7x cores a block
    if Rp != R:
        taps = [jnp.pad(t, ((0, Rp - R), (0, 0))) for t in taps]

    spec = pl.BlockSpec((bm, Cd), lambda i: (i, 0))
    out = pl.pallas_call(
        _max9_kernel,
        out_shape=jax.ShapeDtypeStruct((Rp, Cd), x.dtype),
        grid_spec=pltpu.PrefetchScalarGridSpec(
            num_scalar_prefetch=0,
            grid=(Rp // bm,),
            in_specs=[spec] * 9,
            out_specs=spec),
        compiler_params=pltpu.CompilerParams(dimension_semantics=("parallel",)),
    )(*taps)
    if Rp != R:
        out = out[:R]
    return out.reshape(M, C).reshape(N, Ho, Wo, C)


# ----------------------------------------------------------------------------- #
# ResNet-50 forward
# ----------------------------------------------------------------------------- #
def bottleneck(x, p):
    out = conv_bn(x, p["conv1"], stride=1, pad=0, relu=True)
    out = conv_bn(out, p["conv2"], stride=p["stride"], pad=1, relu=True)
    if "down" in p:
        identity = conv_bn(x, p["down"], stride=p["stride"], pad=0, relu=False)
    else:
        identity = x
    res = identity.astype(jnp.float32).reshape(-1, identity.shape[-1])
    # bn3-bias + f32 residual add + relu fused into the conv3 matmul epilogue.
    out = conv_bn(out, p["conv3"], stride=1, pad=0, relu=True, residual=res)
    return out


def resnet50_forward(x_nchw, params):
    x = jnp.transpose(x_nchw, (0, 2, 3, 1)).astype(jnp.bfloat16)  # NCHW -> NHWC, bf16
    x = conv_bn(x, params["conv1"], stride=2, pad=3, relu=True)
    x = maxpool3x3s2(x)
    for layer_name in ("layer1", "layer2", "layer3", "layer4"):
        for blk in params[layer_name]:
            x = bottleneck(x, blk)
    # Global average pool: tiny plain-JAX reduction (dedicated kernel not worth a launch).
    pooled = jnp.mean(x.astype(jnp.float32), axis=(1, 2))           # (N, 2048)
    # Dropout(0.5) -> identity in eval mode; FC bias fused in the matmul epilogue.
    logits = fused_matmul(pooled, params["fcw"], params["fcb"],
                          relu=False, out_dtype=jnp.float32)
    return logits


# ----------------------------------------------------------------------------- #
# Deterministic parameter initialization (synthetic, not a checkpoint)
# ----------------------------------------------------------------------------- #
class KeyGen:
    def __init__(self, key):
        self.key = key
        self.i = 0

    def __call__(self):
        k = jax.random.fold_in(self.key, self.i)
        self.i += 1
        return k


def init_conv_bn(kg, kh, kw, cin, cout, kpad=None, eps=1e-5):
    """Conv weight with the BatchNorm (inference-form) scale folded in, plus bias."""
    fan_in = kh * kw * cin
    w = (jax.random.normal(kg(), (kh, kw, cin, cout), jnp.float32)
         * (1.0 / jnp.sqrt(float(fan_in))))
    gamma = jax.random.uniform(kg(), (cout,), jnp.float32, 0.5, 1.5)
    beta = jax.random.normal(kg(), (cout,), jnp.float32) * 0.1
    mean = jax.random.normal(kg(), (cout,), jnp.float32) * 0.1
    var = jax.random.uniform(kg(), (cout,), jnp.float32, 0.5, 1.5)
    scale = gamma / jnp.sqrt(var + eps)
    bias = beta - mean * scale
    K = kh * kw * cin
    wf = w.reshape(K, cout) * scale[None, :]          # fold BN scale in f32
    kp = kpad if kpad is not None else K
    if kp > K:
        wf = jnp.pad(wf, ((0, kp - K), (0, 0)))       # 128-align K (stem)
    return {"w": wf.astype(jnp.bfloat16), "kh": kh, "kw": kw, "kpad": kp,
            "b": bias.reshape(1, cout).astype(jnp.float32)}


def make_bottleneck_params(kg, cin, width, stride):
    cout = width * 4
    p = {"stride": stride,
         "conv1": init_conv_bn(kg, 1, 1, cin, width),
         "conv2": init_conv_bn(kg, 3, 3, width, width),
         "conv3": init_conv_bn(kg, 1, 1, width, cout)}
    if stride != 1 or cin != cout:
        p["down"] = init_conv_bn(kg, 1, 1, cin, cout)
    return p


def make_layer(kg, cin, width, blocks, stride):
    ps = [make_bottleneck_params(kg, cin, width, stride)]
    for _ in range(blocks - 1):
        ps.append(make_bottleneck_params(kg, width * 4, width, 1))
    return ps


def make_resnet50_params(key, num_classes=10):
    kg = KeyGen(key)
    params = {"conv1": init_conv_bn(kg, 7, 7, 3, 64, kpad=256)}
    params["layer1"] = make_layer(kg, 64, 64, 3, 1)
    params["layer2"] = make_layer(kg, 256, 128, 4, 2)
    params["layer3"] = make_layer(kg, 512, 256, 6, 2)
    params["layer4"] = make_layer(kg, 1024, 512, 3, 2)
    params["fcw"] = (jax.random.normal(kg(), (2048, num_classes), jnp.float32)
                     * 0.02).astype(jnp.bfloat16)
    params["fcb"] = (jax.random.normal(kg(), (num_classes,), jnp.float32)
                     * 0.02).reshape(1, num_classes)
    return params


# ----------------------------------------------------------------------------- #
if __name__ == "__main__":
    num_classes = 10
    key = jax.random.PRNGKey(0)
    params = make_resnet50_params(jax.random.fold_in(key, 1), num_classes=num_classes)

    # Small NCHW input (batch=2, RGB, 64x64) -- consistent with ResNet-50's stem.
    x = jax.random.normal(jax.random.fold_in(key, 2), (2, 3, 64, 64), jnp.float32)

    logits = resnet50_forward(x, params)
    logits = jax.block_until_ready(logits)

    assert logits.shape == (2, num_classes), logits.shape
    assert jnp.all(jnp.isfinite(logits))
    print("KERNEL_OK")
</pallas_src>

<mosaic_0001>
module attributes {stable_mosaic.version = 11 : i64} {
  func.func @_matmul_epilogue_kernel(%arg0: i32, %arg1: i32, %arg2: memref<512x256xbf16, #tpu.memory_space<vmem>>, %arg3: memref<256x64xbf16, #tpu.memory_space<vmem>>, %arg4: memref<1x64xf32, #tpu.memory_space<vmem>>, %arg5: memref<512x64xbf16, #tpu.memory_space<vmem>>) attributes {dimension_semantics = [#tpu.dimension_semantics<parallel>, #tpu.dimension_semantics<parallel>], iteration_bounds = array<i64: 4, 1>, scalar_prefetch = 0 : i64, scratch_operands = 0 : i64, tpu.core_type = #tpu.core_type<tc>, window_params = [{transform_indices = @transform_0, window_bounds = array<i64: 512, 256>}, {transform_indices = @transform_1, window_bounds = array<i64: 256, 64>}, {transform_indices = @transform_2, window_bounds = array<i64: 1, 64>}, {transform_indices = @transform_3, window_bounds = array<i64: 512, 64>}]} {
    %c0 = arith.constant 0 : index
    %c0_0 = arith.constant 0 : index
    %0 = vector.load %arg2[%c0, %c0_0] : memref<512x256xbf16, #tpu.memory_space<vmem>>, vector<512x256xbf16>
    %c0_1 = arith.constant 0 : index
    %c0_2 = arith.constant 0 : index
    %1 = vector.load %arg3[%c0_1, %c0_2] : memref<256x64xbf16, #tpu.memory_space<vmem>>, vector<256x64xbf16>
    %cst = arith.constant dense<0.000000e+00> : vector<512x64xf32>
    %2 = tpu.matmul %0, %1, %cst {dimension_numbers = #tpu.dot_dimension_numbers<[1], [0], [0], [1], [0, 0, 1, 1], [], []>} : vector<512x256xbf16>, vector<256x64xbf16>, vector<512x64xf32> -> vector<512x64xf32>
    %c0_3 = arith.constant 0 : index
    %c0_4 = arith.constant 0 : index
    %3 = vector.load %arg4[%c0_3, %c0_4] : memref<1x64xf32, #tpu.memory_space<vmem>>, vector<1x64xf32>
    %4 = vector.broadcast %3 : vector<1x64xf32> to vector<512x64xf32>
    %5 = arith.addf %2, %4 : vector<512x64xf32>
    %cst_5 = arith.constant 0.000000e+00 : f32
    %6 = vector.broadcast %cst_5 : f32 to vector<512x64xf32>
    %7 = arith.maximumf %5, %6 : vector<512x64xf32>
    %8 = arith.truncf %7 : vector<512x64xf32> to vector<512x64xbf16>
    %c0_6 = arith.constant 0 : index
    %c0_7 = arith.constant 0 : index
    %9 = vector.load %arg5[%c0_6, %c0_7] : memref<512x64xbf16, #tpu.memory_space<vmem>>, vector<512x64xbf16>
    tpu.vector_store %arg5[%c0_6, %c0_7], %8 {strides = array<i32>} : memref<512x64xbf16, #tpu.memory_space<vmem>>, vector<512x64xbf16>,
    return
  }
  func.func @transform_0(%arg0: i32, %arg1: i32) -> (i32, i32) {
    %c0_i32 = arith.constant 0 : i32
    %c0_i32_0 = arith.constant 0 : i32
    return %arg0, %c0_i32 : i32, i32
  }
  func.func @transform_1(%arg0: i32, %arg1: i32) -> (i32, i32) {
    %c0_i32 = arith.constant 0 : i32
    %c0_i32_0 = arith.constant 0 : i32
    return %c0_i32, %arg1 : i32, i32
  }
  func.func @transform_2(%arg0: i32, %arg1: i32) -> (i32, i32) {
    %c0_i32 = arith.constant 0 : i32
    %c0_i32_0 = arith.constant 0 : i32
    return %c0_i32, %arg1 : i32, i32
  }
  func.func @transform_3(%arg0: i32, %arg1: i32) -> (i32, i32) {
    %c0_i32 = arith.constant 0 : i32
    return %arg0, %arg1 : i32, i32
  }
}

</mosaic_0001>

<bundles_post_ra>
// kernel: tpu_custom_call.1
= control target key start
LH: loop header
LB: loop body
LE: loop exit
PB: predicated region body
PF: predicated region fallthrough
CT: control target
= control target key end

     0   :  { %8 = vsyncpa [#allocation3], 0  ;;  %s2462_s0 = inlined_call_operand.hbm [shape: bf16[2048,256], index: 0, kind: input, shape index: {}]   ;;  %s2463_s1 = inlined_call_operand.vmem [shape: bf16[256,64], index: 1, kind: input, shape index: {}]   ;;  %s2464_s2 = inlined_call_operand.vmem [shape: f32[1,64], index: 2, kind: input, shape index: {}]   ;;  %s2465_s3 = inlined_call_operand.vmem [shape: bf16[2048,64], index: 3, kind: output, shape index: {}]  }
   0x1   :  { %10 = vsyncpa [#allocation3 + $0x1], 0  ;;  %s2004_s12 = smov 0   ;;  %s2006_s13 = smov 0  }
   0x2   :  { %s2008_s14 = smov 0   ;;  %s2010_s15 = smov 0  }
   0x3   :  { %s2012_s16 = smov 0   ;;  %s2014_s17 = smov 0  }
   0x4 LB: > { %s1407_s18 = sadd.s32 4294967295, %s1980_s17   ;;  %s28_s19 = sadd.s32 1, %s1976_s16  ;;  %s1980_s17 = sphi %s2014_s17, %s16_s17   ;;  %s1976_s16 = sphi %s2012_s16, %s2472_s16   ;;  %s1972_s15 = sphi %s2010_s15, %s2471_s15   ;;  %s1968_s14 = sphi %s2008_s14, %s2470_s14   ;;  %s1964_s13 = sphi %s2006_s13, %s2469_s13   ;;  %s1960_s12 = sphi %s2004_s12, %s2468_s12  }
   0x5   : > { %p30_p0 = scmp.ge.s32.totalorder %s28_s19, 4  ;;  %s35_s20 = sadd.s32 1, %s1968_s14 }
   0x6   : > { %p42_p1 = scmp.ne.s32.totalorder %s1968_s14, %s1964_s13  ;;  %p43_p2 = scmp.eq.s32.totalorder %s1980_s17, 0 }
   0x7   : > { %s2474_s19 = smov (%p30_p0, %s28_s19), 0  ;;  %p48_p4 = scmp.ne.s32.totalorder %s1964_s13, %s1960_s12 }
   0x8   : > { %p2040_p3 = por %p43_p2, %p42_p1  ;;  %s32_s22 = ssub.s32 %s1976_s16, %s2474_s19 }
   0x9   : > { %p49_p5 = scmp.eq.s32.totalorder %s1407_s18, 0  ;;  %p33_p6 = scmp.eq.s32.totalorder %s32_s22, 0 }
   0xa   : > { %p1847_p8 = scmp.lt.s32.totalorder %s1980_s17, 4  ;;  %s165_s25 = sand.u32 1, %s1968_s14  }
   0xb   : > { %p2047_p7 = por %p49_p5, %p48_p4  ;;  %s1744_s26 = sshll.u32 %s1976_s16, 9 }
   0xc   : > { %s2053_s24 = scalar_select %p33_p6, %s1968_s14, %s35_s20  }
   0xd   : > { %s1413_s27 = sshll.u32 %s165_s25, 9  ;;  %s175_s30 = scalar_lea.hbm %s2462_s0, %s1744_s26 }
   0xe   : > { %s176_s4 = sshll.u32 %s175_s30, 4  ;;  %s169_s5 = scalar_lea.vmem [#allocation2], %s1413_s27  ;;  %s177_s4 = int_to_ptr.hbm [resolvable:$true] %s176_s4 }
   0xf   : > { %s178_s6 = sshll.u32 %s169_s5, 4  ;;  %p1844_p9 = pnand %p1847_p8, %p2040_p3  ;;  %s179_s6 = int_to_ptr.vmem [resolvable:$true] %s178_s6 }
  0x10   : > { %p1417_p10 = scmp.ge.s32.totalorder %s1980_s17, 1  ;;  %p186_p11 = scmp.lt.s32.totalorder %s1980_s17, 5 }
  0x11   : > { %s166_s7 = scalar_lea.sflag [#allocation3], %s165_s25  ;;  %s1982_s8 = smov 128  }
  0x12   : > { %s1983_s9 = smov 8   ;;  %p187_p12 = pnand %p1417_p10, %p186_p11 }
  0x13   : > { %1846 = dma.hbm_to_vmem [thread:$0]  (!%p1844_p9), %s177_s4, 8192, %s179_s6, %s166_s7, %s1982_s8, %s1982_s8, %s1983_s9  }
  0x14   : > { %190 = sbr.rel (%p187_p12) target bundleno = 447 (0x1bf), region = 32  ;;  %s192_s10 = sand.u32 (!%p187_p12), 1, %s1964_s13  }
  0x15   : > { %s1418_s11 = sshll.u32 (!%p187_p12), %s192_s10, 9  ;;  %s193_s12 = scalar_lea.sflag (!%p187_p12), [#allocation3], %s192_s10 }
  0x16   : > { %s2065_s18 = scalar_lea.vmem (!%p187_p12), [#allocation2], %s1418_s11 }
  0x19   : > { %1955 = dma.done.wait (%p2047_p7), %s193_s12, 8192  }
  0x1a   : > { %1957 = vsyncadd (%p2047_p7), %s193_s12, 4294959104  ;;  %v1816_v0 = vld [vmem:[%s2463_s1 + $0x38] sm:$0xff]  ;;  %v1815_v2 = vld [vmem:[%s2463_s1 + $0x30] sm:$0xff]  ;;  %s1419_s7 = sshll.u32 %s1972_s15, 6  ;;  %vm1229_vm0 = vcmask 519168  }
  0x1b   : > { %v1824_v1 = vld [vmem:[%s2463_s1 + $0x78] sm:$0xff]  ;;  %763 = vmatpush.bf16.msra.mxu0 %v1816_v0  ;;  %1825 = vmatpush.bf16.msra.mxu2 %v1816_v0  ;;  %v1823_v3 = vld [vmem:[%s2463_s1 + $0x70] sm:$0xff]  ;;  %v1814_v4 = vld [vmem:[%s2463_s1 + $0x28] sm:$0xff]  ;;  %p239_p13 = scmp.lt.s32.totalorder %s1419_s7, 255 }
  0x1c   : > { %932 = vmatpush.bf16.msra.mxu1 %v1824_v1  ;;  %1833 = vmatpush.bf16.msra.mxu3 %v1824_v1  ;;  %v1822_v5 = vld [vmem:[%s2463_s1 + $0x68] sm:$0xff]  ;;  %v1813_v6 = vld [vmem:[%s2463_s1 + $0x20] sm:$0xff]  ;;  %v1812_v8 = vld [vmem:[%s2463_s1 + $0x18] sm:$0xff] }
  0x1d   : > { %v1821_v7 = vld [vmem:[%s2463_s1 + $0x60] sm:$0xff]  ;;  %v1820_v9 = vld [vmem:[%s2463_s1 + $0x58] sm:$0xff]  ;;  %v1811_v10 = vld [vmem:[%s2463_s1 + $0x10] sm:$0xff]  ;;  %s2476_s7 = smov (!%p239_p13, %s1419_s7), 255 }
  0x1e   : > { %v1819_v11 = vld [vmem:[%s2463_s1 + $0x50] sm:$0xff]  ;;  %v1810_v12 = vld [vmem:[%s2463_s1 + $0x8] sm:$0xff]  ;;  %v1809_v14 = vld [vmem:[%s2463_s1] sm:$0xff]  ;;  %s1420_s15 = sshll.u32 %s2476_s7, 2 }
  0x1f   : > { %764 = vmatpush.bf16.msra.mxu0 %v1815_v2  ;;  %1826 = vmatpush.bf16.msra.mxu2 %v1815_v2  ;;  %v1818_v13 = vld [vmem:[%s2463_s1 + $0x48] sm:$0xff]  ;;  %v1817_v15 = vld [vmem:[%s2463_s1 + $0x40] sm:$0xff]  ;;  %v1431_v28 = vld [vmem:[%s2065_s18 + $0x10] sm:$0xf]  ;;  %s2201_s12 = scalar_lea.vmem %s2465_s3, %s1420_s15 }
  0x20   : > { %933 = vmatpush.bf16.msra.mxu1 %v1823_v3  ;;  %1834 = vmatpush.bf16.msra.mxu3 %v1823_v3  ;;  %v1423_v16 = vld [vmem:[%s2065_s18] sm:$0xf]  ;;  %v1746_v17 = vld [vmem:[%s2065_s18 + $0x4] sm:$0xf0]  ;;  %v1745_v20 = vld [vmem:[%s2065_s18 + $0x4] sm:$0xf] }
  0x21   : > { %v1551_v18 = vld [vmem:[%s2065_s18 + $0x100] sm:$0xf]  ;;  %v1778_v19 = vld [vmem:[%s2065_s18 + $0x104] sm:$0xf0]  ;;  %v1425_v21 = vld [vmem:[%s2065_s18 + $0x8] sm:$0xf0]  ;;  %v1424_v24 = vor.u32 %v1746_v17, %v1423_v16 }
  0x22   : > { %v1777_v22 = vld [vmem:[%s2065_s18 + $0x104] sm:$0xf]  ;;  %v1553_v23 = vld [vmem:[%s2065_s18 + $0x108] sm:$0xf0]  ;;  %v1552_v25 = vor.u32 %v1778_v19, %v1551_v18  ;;  %v1428_v26 = vor.u32 %v1745_v20, %v1425_v21  ;;  %v1748_v29 = vld [vmem:[%s2065_s18 + $0x14] sm:$0xf0] }
  0x23   : > { %765 = vmatpush.bf16.msra.mxu0 %v1814_v4  ;;  %1827 = vmatpush.bf16.msra.mxu2 %v1814_v4  ;;  %v1556_v27 = vor.u32 %v1777_v22, %v1553_v23  ;;  %v1559_v30 = vld [vmem:[%s2065_s18 + $0x110] sm:$0xf]  ;;  %v1780_v31 = vld [vmem:[%s2065_s18 + $0x114] sm:$0xf0]  ;;  %v1747_v32 = vld [vmem:[%s2065_s18 + $0x14] sm:$0xf]  ;;  %v1432_v36 = vor.u32 %v1748_v29, %v1431_v28 }
  0x24   : > { %934 = vmatpush.bf16.msra.mxu1 %v1822_v5  ;;  %1835 = vmatpush.bf16.msra.mxu3 %v1822_v5  ;;  %v1433_v33 = vld [vmem:[%s2065_s18 + $0x18] sm:$0xf0]  ;;  %v1779_v34 = vld [vmem:[%s2065_s18 + $0x114] sm:$0xf]  ;;  %v1560_v37 = vor.u32 %v1780_v31, %v1559_v30  ;;  %v1439_v40 = vld [vmem:[%s2065_s18 + $0x20] sm:$0xf] }
  0x25   : > { %v1561_v35 = vld [vmem:[%s2065_s18 + $0x118] sm:$0xf0]  ;;  %v1436_v38 = vor.u32 %v1747_v32, %v1433_v33  ;;  %v1750_v41 = vld [vmem:[%s2065_s18 + $0x24] sm:$0xf0]  ;;  %v1567_v42 = vld [vmem:[%s2065_s18 + $0x120] sm:$0xf] }
  0x26   : > { %v1564_v39 = vor.u32 %v1779_v34, %v1561_v35  ;;  %v1782_v43 = vld [vmem:[%s2065_s18 + $0x124] sm:$0xf0]  ;;  %v1749_v44 = vld [vmem:[%s2065_s18 + $0x24] sm:$0xf]  ;;  %v1441_v45 = vld [vmem:[%s2065_s18 + $0x28] sm:$0xf0]  ;;  %v1440_v48 = vor.u32 %v1750_v41, %v1439_v40 }
  0x27   : > { %766 = vmatpush.bf16.msra.mxu0 %v1813_v6  ;;  %1828 = vmatpush.bf16.msra.mxu2 %v1813_v6  ;;  %v1781_v46 = vld [vmem:[%s2065_s18 + $0x124] sm:$0xf]  ;;  %v1569_v47 = vld [vmem:[%s2065_s18 + $0x128] sm:$0xf0]  ;;  %v1568_v49 = vor.u32 %v1782_v43, %v1567_v42  ;;  %v1444_v50 = vor.u32 %v1749_v44, %v1441_v45  ;;  %v1447_v52 = vld [vmem:[%s2065_s18 + $0x30] sm:$0xf] }
  0x28   : > { %935 = vmatpush.bf16.msra.mxu1 %v1821_v7  ;;  %1836 = vmatpush.bf16.msra.mxu3 %v1821_v7  ;;  %v1572_v51 = vor.u32 %v1781_v46, %v1569_v47  ;;  %v1752_v53 = vld [vmem:[%s2065_s18 + $0x34] sm:$0xf0]  ;;  %v1575_v54 = vld [vmem:[%s2065_s18 + $0x130] sm:$0xf]  ;;  %v1751_v56 = vld [vmem:[%s2065_s18 + $0x34] sm:$0xf] }
  0x29   : > { %v1784_v55 = vld [vmem:[%s2065_s18 + $0x134] sm:$0xf0]  ;;  %v1449_v57 = vld [vmem:[%s2065_s18 + $0x38] sm:$0xf0]  ;;  %v1783_v58 = vld [vmem:[%s2065_s18 + $0x134] sm:$0xf]  ;;  %v1448_v60 = vor.u32 %v1752_v53, %v1447_v52 }
  0x2a   : > { %v1577_v59 = vld [vmem:[%s2065_s18 + $0x138] sm:$0xf0]  ;;  %v1576_v61 = vor.u32 %v1784_v55, %v1575_v54  ;;  %v1452_v62 = vor.u32 %v1751_v56, %v1449_v57  ;;  %v1455_v0 = vld [vmem:[%s2065_s18 + $0x40] sm:$0xf]  ;;  %v1754_v1 = vld [vmem:[%s2065_s18 + $0x44] sm:$0xf0] }
  0x2b   : > { %767 = vmatpush.bf16.msra.mxu0 %v1812_v8  ;;  %1829 = vmatpush.bf16.msra.mxu2 %v1812_v8  ;;  %v1580_v63 = vor.u32 %v1783_v58, %v1577_v59  ;;  %v1583_v2 = vld [vmem:[%s2065_s18 + $0x140] sm:$0xf]  ;;  %v1786_v3 = vld [vmem:[%s2065_s18 + $0x144] sm:$0xf0]  ;;  %v1753_v4 = vld [vmem:[%s2065_s18 + $0x44] sm:$0xf]  ;;  %v1456_v8 = vor.u32 %v1754_v1, %v1455_v0 }
  0x2c   : > { %936 = vmatpush.bf16.msra.mxu1 %v1820_v9  ;;  %1837 = vmatpush.bf16.msra.mxu3 %v1820_v9  ;;  %v1457_v5 = vld [vmem:[%s2065_s18 + $0x48] sm:$0xf0]  ;;  %v1785_v6 = vld [vmem:[%s2065_s18 + $0x144] sm:$0xf]  ;;  %v1584_v9 = vor.u32 %v1786_v3, %v1583_v2  ;;  %v1755_v16 = vld [vmem:[%s2065_s18 + $0x54] sm:$0xf] }
  0x2d   : > { %v1585_v7 = vld [vmem:[%s2065_s18 + $0x148] sm:$0xf0]  ;;  %v1465_v17 = vld [vmem:[%s2065_s18 + $0x58] sm:$0xf0]  ;;  %v1787_v18 = vld [vmem:[%s2065_s18 + $0x154] sm:$0xf] }
  0x2e   : > { %v1593_v19 = vld [vmem:[%s2065_s18 + $0x158] sm:$0xf0]  ;;  %v1468_v22 = vor.u32 %v1755_v16, %v1465_v17  ;;  %v1757_v28 = vld [vmem:[%s2065_s18 + $0x64] sm:$0xf]  ;;  %v1473_v29 = vld [vmem:[%s2065_s18 + $0x68] sm:$0xf0] }
  0x2f   : > { %768 = vmatpush.bf16.msra.mxu0 %v1811_v10  ;;  %1830 = vmatpush.bf16.msra.mxu2 %v1811_v10  ;;  %v1460_v10 = vor.u32 %v1753_v4, %v1457_v5  ;;  %v1596_v23 = vor.u32 %v1787_v18, %v1593_v19  ;;  %v1789_v30 = vld [vmem:[%s2065_s18 + $0x164] sm:$0xf]  ;;  %v1601_v31 = vld [vmem:[%s2065_s18 + $0x168] sm:$0xf0]  ;;  %v1476_v34 = vor.u32 %v1757_v28, %v1473_v29  ;;  %v1759_v40 = vld [vmem:[%s2065_s18 + $0x74] sm:$0xf] }
  0x30   : > { %937 = vmatpush.bf16.msra.mxu1 %v1819_v11  ;;  %1838 = vmatpush.bf16.msra.mxu3 %v1819_v11  ;;  %v1588_v11 = vor.u32 %v1785_v6, %v1585_v7  ;;  %v1604_v35 = vor.u32 %v1789_v30, %v1601_v31  ;;  %v1481_v41 = vld [vmem:[%s2065_s18 + $0x78] sm:$0xf0]  ;;  %v1791_v42 = vld [vmem:[%s2065_s18 + $0x174] sm:$0xf]  ;;  %v1794_v52 = vld [vmem:[%s2065_s18 + $0x184] sm:$0xf0] }
  0x31   : > { %v1609_v43 = vld [vmem:[%s2065_s18 + $0x178] sm:$0xf0]  ;;  %v1484_v46 = vor.u32 %v1759_v40, %v1481_v41  ;;  %v1761_v53 = vld [vmem:[%s2065_s18 + $0x84] sm:$0xf]  ;;  %v1489_v54 = vld [vmem:[%s2065_s18 + $0x88] sm:$0xf0] }
  0x32   : > { %v1612_v47 = vor.u32 %v1791_v42, %v1609_v43  ;;  %v1793_v55 = vld [vmem:[%s2065_s18 + $0x184] sm:$0xf]  ;;  %v1617_v56 = vld [vmem:[%s2065_s18 + $0x188] sm:$0xf0]  ;;  %v1763_v16 = vld [vmem:[%s2065_s18 + $0x94] sm:$0xf] }
  0x33   : > { %769 = vmatpush.bf16.msra.mxu0 %v1810_v12  ;;  %1831 = vmatpush.bf16.msra.mxu2 %v1810_v12  ;;  %v1463_v12 = vld [vmem:[%s2065_s18 + $0x50] sm:$0xf]  ;;  %v1497_v17 = vld [vmem:[%s2065_s18 + $0x98] sm:$0xf0] }
  0x34   : > { %938 = vmatpush.bf16.msra.mxu1 %v1818_v13  ;;  %1839 = vmatpush.bf16.msra.mxu3 %v1818_v13  ;;  %v1756_v13 = vld [vmem:[%s2065_s18 + $0x54] sm:$0xf0]  ;;  %v1500_v29 = vor.u32 %v1763_v16, %v1497_v17 }
  0x35   : > { %v1464_v20 = vor.u32 %v1756_v13, %v1463_v12  ;;  %v1764_v13 = vld [vmem:[%s2065_s18 + $0x94] sm:$0xf0] }
  0x37   : > { %770 = vmatpush.bf16.msra.mxu0 %v1809_v14  ;;  %1832 = vmatpush.bf16.msra.mxu2 %v1809_v14  ;;  %v1591_v14 = vld [vmem:[%s2065_s18 + $0x150] sm:$0xf] }
  0x38   : > { %939 = vmatpush.bf16.msra.mxu1 %v1817_v15  ;;  %1840 = vmatpush.bf16.msra.mxu3 %v1817_v15  ;;  %v1788_v15 = vld [vmem:[%s2065_s18 + $0x154] sm:$0xf0] }
  0x39   : > { %v1592_v21 = vor.u32 %v1788_v15, %v1591_v14  ;;  %v1623_v14 = vld [vmem:[%s2065_s18 + $0x190] sm:$0xf]  ;;  %v1796_v15 = vld [vmem:[%s2065_s18 + $0x194] sm:$0xf0] }
  0x3a   : > { %771 = vmatmul.bf16.vlgmr.msra.gmra.mxu0 %v1424_v24  ;;  %851 = vmatmul.bf16.vlgmr.msra.gmra.mxu2 %v1552_v25  ;;  %v1471_v24 = vld [vmem:[%s2065_s18 + $0x60] sm:$0xf]  ;;  %v1758_v25 = vld [vmem:[%s2065_s18 + $0x64] sm:$0xf0] }
  0x3b   : > { %940 = vmatmul.bf16.vlgmr.msra.gmra.mxu1 %v1428_v26  ;;  %1020 = vmatmul.bf16.vlgmr.msra.gmra.mxu3 %v1556_v27  ;;  %v1599_v26 = vld [vmem:[%s2065_s18 + $0x160] sm:$0xf]  ;;  %v1790_v27 = vld [vmem:[%s2065_s18 + $0x164] sm:$0xf0]  ;;  %v1472_v32 = vor.u32 %v1758_v25, %v1471_v24 }
  0x3c   : > { %v1600_v33 = vor.u32 %v1790_v27, %v1599_v26  ;;  %v1624_v27 = vor.u32 %v1796_v15, %v1623_v14 }
  0x4a   : > { %776 = vmatmul.bf16.gmra.mxu0 %v1432_v36  ;;  %856 = vmatmul.bf16.gmra.mxu2 %v1560_v37  ;;  %v1479_v36 = vld [vmem:[%s2065_s18 + $0x70] sm:$0xf]  ;;  %v1760_v37 = vld [vmem:[%s2065_s18 + $0x74] sm:$0xf0] }
  0x4b   : > { %945 = vmatmul.bf16.gmra.mxu1 %v1436_v38  ;;  %1025 = vmatmul.bf16.gmra.mxu3 %v1564_v39  ;;  %v1607_v38 = vld [vmem:[%s2065_s18 + $0x170] sm:$0xf]  ;;  %v1792_v39 = vld [vmem:[%s2065_s18 + $0x174] sm:$0xf0]  ;;  %v1480_v44 = vor.u32 %v1760_v37, %v1479_v36 }
  0x4c   : > { %v1608_v45 = vor.u32 %v1792_v39, %v1607_v38 }
  0x5a   : > { %781 = vmatmul.bf16.gmra.mxu0 %v1440_v48  ;;  %861 = vmatmul.bf16.gmra.mxu2 %v1568_v49  ;;  %v2187_v48 = vld [vmem:[%s2464_s2] ss:$0 sm:$0xff] }
  0x5b   : > { %950 = vmatmul.bf16.gmra.mxu1 %v1444_v50  ;;  %1030 = vmatmul.bf16.gmra.mxu3 %v1572_v51  ;;  %v1487_v49 = vld [vmem:[%s2065_s18 + $0x80] sm:$0xf]  ;;  %v1762_v50 = vld [vmem:[%s2065_s18 + $0x84] sm:$0xf0] }
  0x5c   : > { %v1615_v51 = vld [vmem:[%s2065_s18 + $0x180] sm:$0xf]  ;;  %v1488_v57 = vor.u32 %v1762_v50, %v1487_v49  ;;  %v1766_v50 = vld [vmem:[%s2065_s18 + $0xa4] sm:$0xf0] }
  0x5d   : > { %v1616_v58 = vor.u32 %v1794_v52, %v1615_v51  ;;  %v1631_v51 = vld [vmem:[%s2065_s18 + $0x1a0] sm:$0xf]  ;;  %v1798_v52 = vld [vmem:[%s2065_s18 + $0x1a4] sm:$0xf0] }
  0x6a   : > { %786 = vmatmul.bf16.gmra.mxu0 %v1448_v60  ;;  %866 = vmatmul.bf16.gmra.mxu2 %v1576_v61  ;;  %v1492_v60 = vor.u32 %v1761_v53, %v1489_v54  ;;  %v1620_v61 = vor.u32 %v1793_v55, %v1617_v56  ;;  %v1765_v53 = vld [vmem:[%s2065_s18 + $0xa4] sm:$0xf]  ;;  %v1505_v54 = vld [vmem:[%s2065_s18 + $0xa8] sm:$0xf0] }
  0x6b   : > { %955 = vmatmul.bf16.gmra.mxu1 %v1452_v62  ;;  %1035 = vmatmul.bf16.gmra.mxu3 %v1580_v63 }
  0x7a   : > { %791 = vmatmul.bf16.gmra.mxu0 %v1456_v8  ;;  %871 = vmatmul.bf16.gmra.mxu2 %v1584_v9 }
  0x7b   : > { %960 = vmatmul.bf16.gmra.mxu1 %v1460_v10  ;;  %1040 = vmatmul.bf16.gmra.mxu3 %v1588_v11  ;;  %v1495_v10 = vld [vmem:[%s2065_s18 + $0x90] sm:$0xf] }
  0x7c   : > { %v1496_v26 = vor.u32 %v1764_v13, %v1495_v10 }
  0x8a   : > { %796 = vmatmul.bf16.gmra.mxu0 %v1464_v20  ;;  %876 = vmatmul.bf16.gmra.mxu2 %v1592_v21  ;;  %v1795_v20 = vld [vmem:[%s2065_s18 + $0x194] sm:$0xf]  ;;  %v1625_v21 = vld [vmem:[%s2065_s18 + $0x198] sm:$0xf0] }
  0x8b   : > { %965 = vmatmul.bf16.gmra.mxu1 %v1468_v22  ;;  %1045 = vmatmul.bf16.gmra.mxu3 %v1596_v23  ;;  %v1628_v30 = vor.u32 %v1795_v20, %v1625_v21 }
  0x9a   : > { %801 = vmatmul.bf16.gmra.mxu0 %v1472_v32  ;;  %881 = vmatmul.bf16.gmra.mxu2 %v1600_v33 }
  0x9b   : > { %970 = vmatmul.bf16.gmra.mxu1 %v1476_v34  ;;  %1050 = vmatmul.bf16.gmra.mxu3 %v1604_v35 }
  0xaa   : > { %806 = vmatmul.bf16.gmra.mxu0 %v1480_v44  ;;  %886 = vmatmul.bf16.gmra.mxu2 %v1608_v45 }
  0xab   : > { %975 = vmatmul.bf16.gmra.mxu1 %v1484_v46  ;;  %1055 = vmatmul.bf16.gmra.mxu3 %v1612_v47  ;;  %v1503_v46 = vld [vmem:[%s2065_s18 + $0xa0] sm:$0xf] }
  0xb7   : > { %v772_v59 = vpop.f32.mrf.mxu0 }
  0xb8   : > { %v773_v62 = vadd.f32 %v2187_v48, %v772_v59  ;;  %v941_v63 = vpop.f32.mrf.mxu1 }
  0xba   : > { %v942_v0 = vadd.f32 %v941_v63, %v773_v62  ;;  %811 = vmatmul.bf16.gmra.mxu0 %v1488_v57  ;;  %891 = vmatmul.bf16.gmra.mxu2 %v1616_v58  ;;  %v1797_v57 = vld [vmem:[%s2065_s18 + $0x1a4] sm:$0xf]  ;;  %v1633_v58 = vld [vmem:[%s2065_s18 + $0x1a8] sm:$0xf0]  ;;  %v1504_v63 = vor.u32 %v1766_v50, %v1503_v46 }
  0xbb   : > { %980 = vmatmul.bf16.gmra.mxu1 %v1492_v60  ;;  %1060 = vmatmul.bf16.gmra.mxu3 %v1620_v61 }
  0xbc   : > { %v1101_v1 = vmax.f32 %v942_v0, 0.0  ;;  %v1632_v0 = vor.u32 %v1798_v52, %v1631_v51 }
  0xbd   : > { %v852_v2 = vpop.f32.mrf.mxu2 }
  0xbe   : > { %v1165_v3 = vpack.c.bf16 %v1101_v1, %v1101_v1  ;;  %v853_v4 = vadd.f32 %v2187_v48, %v852_v2  ;;  %v1021_v5 = vpop.f32.mrf.mxu3  ;;  %v1508_v2 = vor.u32 %v1765_v53, %v1505_v54 }
  0xbf   : > { %v774_v6 = vpop.f32.mrf.mxu0 }
  0xc0   : > { %1230 = vst.msk [vmem:[%s2201_s12] sm:$0xf] %vm1229_vm0, %v1165_v3  ;;  %v1022_v7 = vadd.f32 %v1021_v5, %v853_v4  ;;  %v775_v8 = vadd.f32 %v2187_v48, %v774_v6  ;;  %v943_v9 = vpop.f32.mrf.mxu1  ;;  %v1636_v3 = vor.u32 %v1797_v57, %v1633_v58 }
  0xc2   : > { %v1133_v11 = vmax.f32 %v1022_v7, 0.0  ;;  %v944_v12 = vadd.f32 %v943_v9, %v775_v8 }
  0xc4   : > { %v1197_v18 = vpack.c.bf16 %v1133_v11, %v1133_v11  ;;  %v1102_v19 = vmax.f32 %v944_v12, 0.0 }
  0xc5   : > { %v854_v22 = vpop.f32.mrf.mxu2 }
  0xc6   : > { %1262 = vst.msk [vmem:[%s2201_s12 + $0x80] sm:$0xf] %vm1229_vm0, %v1197_v18  ;;  %v1166_v23 = vpack.c.bf16 %v1102_v19, %v1102_v19  ;;  %v855_v24 = vadd.f32 %v2187_v48, %v854_v22  ;;  %v1023_v25 = vpop.f32.mrf.mxu3  ;;  %v1511_v19 = vld [vmem:[%s2065_s18 + $0xb0] sm:$0xf]  ;;  %v1768_v22 = vld [vmem:[%s2065_s18 + $0xb4] sm:$0xf0] }
  0xc7   : > { %v777_v28 = vpop.f32.mrf.mxu0 }
  0xc8   : > { %1231 = vst.msk [vmem:[%s2201_s12 + $0x4] sm:$0xf] %vm1229_vm0, %v1166_v23  ;;  %v1024_v31 = vadd.f32 %v1023_v25, %v855_v24  ;;  %v778_v32 = vadd.f32 %v2187_v48, %v777_v28  ;;  %v946_v33 = vpop.f32.mrf.mxu1  ;;  %v1639_v23 = vld [vmem:[%s2065_s18 + $0x1b0] sm:$0xf]  ;;  %v1800_v24 = vld [vmem:[%s2065_s18 + $0x1b4] sm:$0xf0] }
  0xc9   : > { %v1767_v25 = vld [vmem:[%s2065_s18 + $0xb4] sm:$0xf] }
  0xca   : > { %v1134_v34 = vmax.f32 %v1024_v31, 0.0  ;;  %v947_v35 = vadd.f32 %v946_v33, %v778_v32  ;;  %816 = vmatmul.bf16.gmra.mxu0 %v1496_v26  ;;  %896 = vmatmul.bf16.gmra.mxu2 %v1624_v27  ;;  %v1513_v26 = vld [vmem:[%s2065_s18 + $0xb8] sm:$0xf0] }
  0xcb   : > { %985 = vmatmul.bf16.gmra.mxu1 %v1500_v29  ;;  %1065 = vmatmul.bf16.gmra.mxu3 %v1628_v30  ;;  %v1799_v29 = vld [vmem:[%s2065_s18 + $0x1b4] sm:$0xf]  ;;  %v1641_v30 = vld [vmem:[%s2065_s18 + $0x1b8] sm:$0xf0] }
  0xcc   : > { %v1198_v36 = vpack.c.bf16 %v1134_v34, %v1134_v34  ;;  %v1103_v37 = vmax.f32 %v947_v35, 0.0  ;;  %v1512_v35 = vor.u32 %v1768_v22, %v1511_v19 }
  0xcd   : > { %v857_v38 = vpop.f32.mrf.mxu2 }
  0xce   : > { %1263 = vst.msk [vmem:[%s2201_s12 + $0x84] sm:$0xf] %vm1229_vm0, %v1198_v36  ;;  %v1167_v39 = vpack.c.bf16 %v1103_v37, %v1103_v37  ;;  %v858_v40 = vadd.f32 %v2187_v48, %v857_v38  ;;  %v1026_v41 = vpop.f32.mrf.mxu3  ;;  %v1640_v36 = vor.u32 %v1800_v24, %v1639_v23  ;;  %v1516_v38 = vor.u32 %v1767_v25, %v1513_v26 }
  0xcf   : > { %v779_v42 = vpop.f32.mrf.mxu0 }
  0xd0   : > { %1232 = vst.msk [vmem:[%s2201_s12 + $0x8] sm:$0xf] %vm1229_vm0, %v1167_v39  ;;  %v1027_v43 = vadd.f32 %v1026_v41, %v858_v40  ;;  %v780_v44 = vadd.f32 %v2187_v48, %v779_v42  ;;  %v948_v45 = vpop.f32.mrf.mxu1  ;;  %v1644_v39 = vor.u32 %v1799_v29, %v1641_v30 }
  0xd2   : > { %v1135_v47 = vmax.f32 %v1027_v43, 0.0  ;;  %v949_v49 = vadd.f32 %v948_v45, %v780_v44 }
  0xd4   : > { %v1199_v55 = vpack.c.bf16 %v1135_v47, %v1135_v47  ;;  %v1104_v56 = vmax.f32 %v949_v49, 0.0 }
  0xd5   : > { %v859_v59 = vpop.f32.mrf.mxu2 }
  0xd6   : > { %1264 = vst.msk [vmem:[%s2201_s12 + $0x88] sm:$0xf] %vm1229_vm0, %v1199_v55  ;;  %v1168_v60 = vpack.c.bf16 %v1104_v56, %v1104_v56  ;;  %v860_v61 = vadd.f32 %v2187_v48, %v859_v59  ;;  %v1028_v62 = vpop.f32.mrf.mxu3  ;;  %v1519_v56 = vld [vmem:[%s2065_s18 + $0xc0] sm:$0xf]  ;;  %v1770_v59 = vld [vmem:[%s2065_s18 + $0xc4] sm:$0xf0] }
  0xd7   : > { %v782_v1 = vpop.f32.mrf.mxu0 }
  0xd8   : > { %1233 = vst.msk [vmem:[%s2201_s12 + $0xc] sm:$0xf] %vm1229_vm0, %v1168_v60  ;;  %v1029_v4 = vadd.f32 %v1028_v62, %v860_v61  ;;  %v783_v5 = vadd.f32 %v2187_v48, %v782_v1  ;;  %v951_v6 = vpop.f32.mrf.mxu1  ;;  %v1647_v60 = vld [vmem:[%s2065_s18 + $0x1c0] sm:$0xf]  ;;  %v1802_v61 = vld [vmem:[%s2065_s18 + $0x1c4] sm:$0xf0] }
  0xd9   : > { %v1769_v62 = vld [vmem:[%s2065_s18 + $0xc4] sm:$0xf] }
  0xda   : > { %v1136_v7 = vmax.f32 %v1029_v4, 0.0  ;;  %v952_v8 = vadd.f32 %v951_v6, %v783_v5  ;;  %821 = vmatmul.bf16.gmra.mxu0 %v1504_v63  ;;  %901 = vmatmul.bf16.gmra.mxu2 %v1632_v0  ;;  %v1521_v63 = vld [vmem:[%s2065_s18 + $0xc8] sm:$0xf0] }
  0xdb   : > { %990 = vmatmul.bf16.gmra.mxu1 %v1508_v2  ;;  %1070 = vmatmul.bf16.gmra.mxu3 %v1636_v3  ;;  %v1801_v2 = vld [vmem:[%s2065_s18 + $0x1c4] sm:$0xf]  ;;  %v1649_v3 = vld [vmem:[%s2065_s18 + $0x1c8] sm:$0xf0] }
  0xdc   : > { %v1200_v9 = vpack.c.bf16 %v1136_v7, %v1136_v7  ;;  %v1105_v10 = vmax.f32 %v952_v8, 0.0  ;;  %v1520_v8 = vor.u32 %v1770_v59, %v1519_v56 }
  0xdd   : > { %v862_v11 = vpop.f32.mrf.mxu2 }
  0xde   : > { %1265 = vst.msk [vmem:[%s2201_s12 + $0x8c] sm:$0xf] %vm1229_vm0, %v1200_v9  ;;  %v1169_v12 = vpack.c.bf16 %v1105_v10, %v1105_v10  ;;  %v863_v13 = vadd.f32 %v2187_v48, %v862_v11  ;;  %v1031_v14 = vpop.f32.mrf.mxu3  ;;  %v1648_v9 = vor.u32 %v1802_v61, %v1647_v60  ;;  %v1524_v11 = vor.u32 %v1769_v62, %v1521_v63 }
  0xdf   : > { %v784_v15 = vpop.f32.mrf.mxu0 }
  0xe0   : > { %1234 = vst.msk [vmem:[%s2201_s12 + $0x10] sm:$0xf] %vm1229_vm0, %v1169_v12  ;;  %v1032_v16 = vadd.f32 %v1031_v14, %v863_v13  ;;  %v785_v17 = vadd.f32 %v2187_v48, %v784_v15  ;;  %v953_v18 = vpop.f32.mrf.mxu1  ;;  %v1652_v12 = vor.u32 %v1801_v2, %v1649_v3 }
  0xe2   : > { %v1137_v20 = vmax.f32 %v1032_v16, 0.0  ;;  %v954_v21 = vadd.f32 %v953_v18, %v785_v17 }
  0xe4   : > { %v1201_v27 = vpack.c.bf16 %v1137_v20, %v1137_v20  ;;  %v1106_v28 = vmax.f32 %v954_v21, 0.0 }
  0xe5   : > { %v864_v31 = vpop.f32.mrf.mxu2 }
  0xe6   : > { %1266 = vst.msk [vmem:[%s2201_s12 + $0x90] sm:$0xf] %vm1229_vm0, %v1201_v27  ;;  %v1170_v32 = vpack.c.bf16 %v1106_v28, %v1106_v28  ;;  %v865_v33 = vadd.f32 %v2187_v48, %v864_v31  ;;  %v1033_v34 = vpop.f32.mrf.mxu3  ;;  %v1527_v28 = vld [vmem:[%s2065_s18 + $0xd0] sm:$0xf]  ;;  %v1772_v31 = vld [vmem:[%s2065_s18 + $0xd4] sm:$0xf0] }
  0xe7   : > { %v787_v37 = vpop.f32.mrf.mxu0 }
  0xe8   : > { %1235 = vst.msk [vmem:[%s2201_s12 + $0x14] sm:$0xf] %vm1229_vm0, %v1170_v32  ;;  %v1034_v40 = vadd.f32 %v1033_v34, %v865_v33  ;;  %v788_v41 = vadd.f32 %v2187_v48, %v787_v37  ;;  %v956_v42 = vpop.f32.mrf.mxu1  ;;  %v1655_v32 = vld [vmem:[%s2065_s18 + $0x1d0] sm:$0xf]  ;;  %v1804_v33 = vld [vmem:[%s2065_s18 + $0x1d4] sm:$0xf0] }
  0xe9   : > { %v1771_v34 = vld [vmem:[%s2065_s18 + $0xd4] sm:$0xf] }
  0xea   : > { %v1138_v43 = vmax.f32 %v1034_v40, 0.0  ;;  %v957_v44 = vadd.f32 %v956_v42, %v788_v41  ;;  %826 = vmatmul.bf16.gmra.mxu0 %v1512_v35  ;;  %906 = vmatmul.bf16.gmra.mxu2 %v1640_v36  ;;  %v1529_v35 = vld [vmem:[%s2065_s18 + $0xd8] sm:$0xf0] }
  0xeb   : > { %995 = vmatmul.bf16.gmra.mxu1 %v1516_v38  ;;  %1075 = vmatmul.bf16.gmra.mxu3 %v1644_v39  ;;  %v1803_v38 = vld [vmem:[%s2065_s18 + $0x1d4] sm:$0xf]  ;;  %v1657_v39 = vld [vmem:[%s2065_s18 + $0x1d8] sm:$0xf0] }
  0xec   : > { %v1202_v45 = vpack.c.bf16 %v1138_v43, %v1138_v43  ;;  %v1107_v46 = vmax.f32 %v957_v44, 0.0  ;;  %v1528_v44 = vor.u32 %v1772_v31, %v1527_v28 }
  0xed   : > { %v867_v47 = vpop.f32.mrf.mxu2 }
  0xee   : > { %1267 = vst.msk [vmem:[%s2201_s12 + $0x94] sm:$0xf] %vm1229_vm0, %v1202_v45  ;;  %v1171_v49 = vpack.c.bf16 %v1107_v46, %v1107_v46  ;;  %v868_v50 = vadd.f32 %v2187_v48, %v867_v47  ;;  %v1036_v51 = vpop.f32.mrf.mxu3  ;;  %v1656_v45 = vor.u32 %v1804_v33, %v1655_v32  ;;  %v1532_v47 = vor.u32 %v1771_v34, %v1529_v35 }
  0xef   : > { %v789_v52 = vpop.f32.mrf.mxu0 }
  0xf0   : > { %1236 = vst.msk [vmem:[%s2201_s12 + $0x18] sm:$0xf] %vm1229_vm0, %v1171_v49  ;;  %v1037_v53 = vadd.f32 %v1036_v51, %v868_v50  ;;  %v790_v54 = vadd.f32 %v2187_v48, %v789_v52  ;;  %v958_v55 = vpop.f32.mrf.mxu1  ;;  %v1660_v49 = vor.u32 %v1803_v38, %v1657_v39 }
  0xf2   : > { %v1139_v57 = vmax.f32 %v1037_v53, 0.0  ;;  %v959_v58 = vadd.f32 %v958_v55, %v790_v54 }
  0xf4   : > { %v1203_v0 = vpack.c.bf16 %v1139_v57, %v1139_v57  ;;  %v1108_v1 = vmax.f32 %v959_v58, 0.0 }
  0xf5   : > { %v869_v4 = vpop.f32.mrf.mxu2 }
  0xf6   : > { %1268 = vst.msk [vmem:[%s2201_s12 + $0x98] sm:$0xf] %vm1229_vm0, %v1203_v0  ;;  %v1172_v5 = vpack.c.bf16 %v1108_v1, %v1108_v1  ;;  %v870_v6 = vadd.f32 %v2187_v48, %v869_v4  ;;  %v1038_v7 = vpop.f32.mrf.mxu3  ;;  %v1535_v1 = vld [vmem:[%s2065_s18 + $0xe0] sm:$0xf]  ;;  %v1774_v4 = vld [vmem:[%s2065_s18 + $0xe4] sm:$0xf0] }
  0xf7   : > { %v792_v10 = vpop.f32.mrf.mxu0 }
  0xf8   : > { %1237 = vst.msk [vmem:[%s2201_s12 + $0x1c] sm:$0xf] %vm1229_vm0, %v1172_v5  ;;  %v1039_v13 = vadd.f32 %v1038_v7, %v870_v6  ;;  %v793_v14 = vadd.f32 %v2187_v48, %v792_v10  ;;  %v961_v15 = vpop.f32.mrf.mxu1  ;;  %v1663_v5 = vld [vmem:[%s2065_s18 + $0x1e0] sm:$0xf]  ;;  %v1806_v6 = vld [vmem:[%s2065_s18 + $0x1e4] sm:$0xf0] }
  0xf9   : > { %v1773_v7 = vld [vmem:[%s2065_s18 + $0xe4] sm:$0xf] }
  0xfa   : > { %v1140_v16 = vmax.f32 %v1039_v13, 0.0  ;;  %v962_v17 = vadd.f32 %v961_v15, %v793_v14  ;;  %831 = vmatmul.bf16.gmra.mxu0 %v1520_v8  ;;  %911 = vmatmul.bf16.gmra.mxu2 %v1648_v9  ;;  %v1537_v8 = vld [vmem:[%s2065_s18 + $0xe8] sm:$0xf0] }
  0xfb   : > { %1000 = vmatmul.bf16.gmra.mxu1 %v1524_v11  ;;  %1080 = vmatmul.bf16.gmra.mxu3 %v1652_v12  ;;  %v1805_v11 = vld [vmem:[%s2065_s18 + $0x1e4] sm:$0xf]  ;;  %v1665_v12 = vld [vmem:[%s2065_s18 + $0x1e8] sm:$0xf0] }
  0xfc   : > { %v1204_v18 = vpack.c.bf16 %v1140_v16, %v1140_v16  ;;  %v1109_v19 = vmax.f32 %v962_v17, 0.0  ;;  %v1536_v17 = vor.u32 %v1774_v4, %v1535_v1 }
  0xfd   : > { %v872_v20 = vpop.f32.mrf.mxu2 }
  0xfe   : > { %1269 = vst.msk [vmem:[%s2201_s12 + $0x9c] sm:$0xf] %vm1229_vm0, %v1204_v18  ;;  %v1173_v21 = vpack.c.bf16 %v1109_v19, %v1109_v19  ;;  %v873_v22 = vadd.f32 %v2187_v48, %v872_v20  ;;  %v1041_v23 = vpop.f32.mrf.mxu3  ;;  %v1664_v18 = vor.u32 %v1806_v6, %v1663_v5  ;;  %v1540_v20 = vor.u32 %v1773_v7, %v1537_v8 }
  0xff   : > { %v794_v24 = vpop.f32.mrf.mxu0 }
 0x100   : > { %1238 = vst.msk [vmem:[%s2201_s12 + $0x20] sm:$0xf] %vm1229_vm0, %v1173_v21  ;;  %v1042_v25 = vadd.f32 %v1041_v23, %v873_v22  ;;  %v795_v26 = vadd.f32 %v2187_v48, %v794_v24  ;;  %v963_v27 = vpop.f32.mrf.mxu1  ;;  %v1668_v21 = vor.u32 %v1805_v11, %v1665_v12 }
 0x102   : > { %v1141_v29 = vmax.f32 %v1042_v25, 0.0  ;;  %v964_v30 = vadd.f32 %v963_v27, %v795_v26 }
 0x104   : > { %v1205_v36 = vpack.c.bf16 %v1141_v29, %v1141_v29  ;;  %v1110_v37 = vmax.f32 %v964_v30, 0.0 }
 0x105   : > { %v874_v40 = vpop.f32.mrf.mxu2 }
 0x106   : > { %1270 = vst.msk [vmem:[%s2201_s12 + $0xa0] sm:$0xf] %vm1229_vm0, %v1205_v36  ;;  %v1174_v41 = vpack.c.bf16 %v1110_v37, %v1110_v37  ;;  %v875_v42 = vadd.f32 %v2187_v48, %v874_v40  ;;  %v1043_v43 = vpop.f32.mrf.mxu3  ;;  %v1543_v37 = vld [vmem:[%s2065_s18 + $0xf0] sm:$0xf]  ;;  %v1776_v40 = vld [vmem:[%s2065_s18 + $0xf4] sm:$0xf0] }
 0x107   : > { %v797_v46 = vpop.f32.mrf.mxu0 }
 0x108   : > { %1239 = vst.msk [vmem:[%s2201_s12 + $0x24] sm:$0xf] %vm1229_vm0, %v1174_v41  ;;  %v1044_v50 = vadd.f32 %v1043_v43, %v875_v42  ;;  %v798_v51 = vadd.f32 %v2187_v48, %v797_v46  ;;  %v966_v52 = vpop.f32.mrf.mxu1  ;;  %v1671_v41 = vld [vmem:[%s2065_s18 + $0x1f0] sm:$0xf]  ;;  %v1808_v42 = vld [vmem:[%s2065_s18 + $0x1f4] sm:$0xf0] }
 0x109   : > { %v1775_v43 = vld [vmem:[%s2065_s18 + $0xf4] sm:$0xf] }
 0x10a   : > { %v1142_v53 = vmax.f32 %v1044_v50, 0.0  ;;  %v967_v54 = vadd.f32 %v966_v52, %v798_v51  ;;  %836 = vmatmul.bf16.gmra.mxu0 %v1528_v44  ;;  %916 = vmatmul.bf16.gmra.mxu2 %v1656_v45  ;;  %v1545_v44 = vld [vmem:[%s2065_s18 + $0xf8] sm:$0xf0] }
 0x10b   : > { %1005 = vmatmul.bf16.gmra.mxu1 %v1532_v47  ;;  %1085 = vmatmul.bf16.gmra.mxu3 %v1660_v49  ;;  %v1807_v47 = vld [vmem:[%s2065_s18 + $0x1f4] sm:$0xf]  ;;  %v1673_v49 = vld [vmem:[%s2065_s18 + $0x1f8] sm:$0xf0] }
 0x10c   : > { %v1206_v55 = vpack.c.bf16 %v1142_v53, %v1142_v53  ;;  %v1111_v56 = vmax.f32 %v967_v54, 0.0  ;;  %v1544_v54 = vor.u32 %v1776_v40, %v1543_v37 }
 0x10d   : > { %v877_v57 = vpop.f32.mrf.mxu2 }
 0x10e   : > { %1271 = vst.msk [vmem:[%s2201_s12 + $0xa4] sm:$0xf] %vm1229_vm0, %v1206_v55  ;;  %v1175_v58 = vpack.c.bf16 %v1111_v56, %v1111_v56  ;;  %v878_v59 = vadd.f32 %v2187_v48, %v877_v57  ;;  %v1046_v60 = vpop.f32.mrf.mxu3  ;;  %v1672_v55 = vor.u32 %v1808_v42, %v1671_v41  ;;  %v1548_v57 = vor.u32 %v1775_v43, %v1545_v44 }
 0x10f   : > { %v799_v61 = vpop.f32.mrf.mxu0 }
 0x110   : > { %1240 = vst.msk [vmem:[%s2201_s12 + $0x28] sm:$0xf] %vm1229_vm0, %v1175_v58  ;;  %v1047_v62 = vadd.f32 %v1046_v60, %v878_v59  ;;  %v800_v63 = vadd.f32 %v2187_v48, %v799_v61  ;;  %v968_v0 = vpop.f32.mrf.mxu1  ;;  %v1676_v58 = vor.u32 %v1807_v47, %v1673_v49 }
 0x112   : > { %v1143_v2 = vmax.f32 %v1047_v62, 0.0  ;;  %v969_v3 = vadd.f32 %v968_v0, %v800_v63 }
 0x114   : > { %v1207_v9 = vpack.c.bf16 %v1143_v2, %v1143_v2  ;;  %v1112_v10 = vmax.f32 %v969_v3, 0.0 }
 0x115   : > { %v879_v13 = vpop.f32.mrf.mxu2 }
 0x116   : > { %1272 = vst.msk [vmem:[%s2201_s12 + $0xa8] sm:$0xf] %vm1229_vm0, %v1207_v9  ;;  %v1176_v14 = vpack.c.bf16 %v1112_v10, %v1112_v10  ;;  %v880_v15 = vadd.f32 %v2187_v48, %v879_v13  ;;  %v1048_v16 = vpop.f32.mrf.mxu3 }
 0x117   : > { %v802_v19 = vpop.f32.mrf.mxu0 }
 0x118   : > { %1241 = vst.msk [vmem:[%s2201_s12 + $0x2c] sm:$0xf] %vm1229_vm0, %v1176_v14  ;;  %v1049_v22 = vadd.f32 %v1048_v16, %v880_v15  ;;  %v803_v23 = vadd.f32 %v2187_v48, %v802_v19  ;;  %v971_v24 = vpop.f32.mrf.mxu1 }
 0x11a   : > { %v1144_v25 = vmax.f32 %v1049_v22, 0.0  ;;  %v972_v26 = vadd.f32 %v971_v24, %v803_v23  ;;  %841 = vmatmul.bf16.gmra.mxu0 %v1536_v17  ;;  %921 = vmatmul.bf16.gmra.mxu2 %v1664_v18 }
 0x11b   : > { %1010 = vmatmul.bf16.gmra.mxu1 %v1540_v20  ;;  %1090 = vmatmul.bf16.gmra.mxu3 %v1668_v21 }
 0x11c   : > { %v1208_v27 = vpack.c.bf16 %v1144_v25, %v1144_v25  ;;  %v1113_v28 = vmax.f32 %v972_v26, 0.0 }
 0x11d   : > { %v882_v29 = vpop.f32.mrf.mxu2 }
 0x11e   : > { %1273 = vst.msk [vmem:[%s2201_s12 + $0xac] sm:$0xf] %vm1229_vm0, %v1208_v27  ;;  %v1177_v30 = vpack.c.bf16 %v1113_v28, %v1113_v28  ;;  %v883_v31 = vadd.f32 %v2187_v48, %v882_v29  ;;  %v1051_v32 = vpop.f32.mrf.mxu3 }
 0x11f   : > { %v804_v33 = vpop.f32.mrf.mxu0 }
 0x120   : > { %1242 = vst.msk [vmem:[%s2201_s12 + $0x30] sm:$0xf] %vm1229_vm0, %v1177_v30  ;;  %v1052_v34 = vadd.f32 %v1051_v32, %v883_v31  ;;  %v805_v35 = vadd.f32 %v2187_v48, %v804_v33  ;;  %v973_v36 = vpop.f32.mrf.mxu1 }
 0x122   : > { %v1145_v38 = vmax.f32 %v1052_v34, 0.0  ;;  %v974_v39 = vadd.f32 %v973_v36, %v805_v35 }
 0x124   : > { %v1209_v45 = vpack.c.bf16 %v1145_v38, %v1145_v38  ;;  %v1114_v46 = vmax.f32 %v974_v39, 0.0 }
 0x125   : > { %v884_v50 = vpop.f32.mrf.mxu2 }
 0x126   : > { %1274 = vst.msk [vmem:[%s2201_s12 + $0xb0] sm:$0xf] %vm1229_vm0, %v1209_v45  ;;  %v1178_v51 = vpack.c.bf16 %v1114_v46, %v1114_v46  ;;  %v885_v52 = vadd.f32 %v2187_v48, %v884_v50  ;;  %v1053_v53 = vpop.f32.mrf.mxu3 }
 0x127   : > { %v807_v56 = vpop.f32.mrf.mxu0 }
 0x128   : > { %1243 = vst.msk [vmem:[%s2201_s12 + $0x34] sm:$0xf] %vm1229_vm0, %v1178_v51  ;;  %v1054_v59 = vadd.f32 %v1053_v53, %v885_v52  ;;  %v808_v60 = vadd.f32 %v2187_v48, %v807_v56  ;;  %v976_v61 = vpop.f32.mrf.mxu1 }
 0x12a   : > { %v1146_v62 = vmax.f32 %v1054_v59, 0.0  ;;  %v977_v63 = vadd.f32 %v976_v61, %v808_v60  ;;  %846 = vmatmul.bf16.gmra.mxu0 %v1544_v54  ;;  %926 = vmatmul.bf16.gmra.mxu2 %v1672_v55 }
 0x12b   : > { %1015 = vmatmul.bf16.gmra.mxu1 %v1548_v57  ;;  %1095 = vmatmul.bf16.gmra.mxu3 %v1676_v58 }
 0x12c   : > { %v1210_v0 = vpack.c.bf16 %v1146_v62, %v1146_v62  ;;  %v1115_v1 = vmax.f32 %v977_v63, 0.0 }
 0x12d   : > { %v887_v2 = vpop.f32.mrf.mxu2 }
 0x12e   : > { %1275 = vst.msk [vmem:[%s2201_s12 + $0xb4] sm:$0xf] %vm1229_vm0, %v1210_v0  ;;  %v1179_v3 = vpack.c.bf16 %v1115_v1, %v1115_v1  ;;  %v888_v4 = vadd.f32 %v2187_v48, %v887_v2  ;;  %v1056_v5 = vpop.f32.mrf.mxu3 }
 0x12f   : > { %v809_v6 = vpop.f32.mrf.mxu0 }
 0x130   : > { %1244 = vst.msk [vmem:[%s2201_s12 + $0x38] sm:$0xf] %vm1229_vm0, %v1179_v3  ;;  %v1057_v7 = vadd.f32 %v1056_v5, %v888_v4  ;;  %v810_v8 = vadd.f32 %v2187_v48, %v809_v6  ;;  %v978_v9 = vpop.f32.mrf.mxu1 }
 0x132   : > { %v1147_v10 = vmax.f32 %v1057_v7, 0.0  ;;  %v979_v11 = vadd.f32 %v978_v9, %v810_v8 }
 0x134   : > { %v1211_v12 = vpack.c.bf16 %v1147_v10, %v1147_v10  ;;  %v1116_v13 = vmax.f32 %v979_v11, 0.0 }
 0x135   : > { %v889_v14 = vpop.f32.mrf.mxu2 }
 0x136   : > { %1276 = vst.msk [vmem:[%s2201_s12 + $0xb8] sm:$0xf] %vm1229_vm0, %v1211_v12  ;;  %v1180_v15 = vpack.c.bf16 %v1116_v13, %v1116_v13  ;;  %v890_v16 = vadd.f32 %v2187_v48, %v889_v14  ;;  %v1058_v17 = vpop.f32.mrf.mxu3 }
 0x137   : > { %v812_v18 = vpop.f32.mrf.mxu0 }
 0x138   : > { %1245 = vst.msk [vmem:[%s2201_s12 + $0x3c] sm:$0xf] %vm1229_vm0, %v1180_v15  ;;  %v1059_v19 = vadd.f32 %v1058_v17, %v890_v16  ;;  %v813_v20 = vadd.f32 %v2187_v48, %v812_v18  ;;  %v981_v21 = vpop.f32.mrf.mxu1 }
 0x13a   : > { %v1148_v22 = vmax.f32 %v1059_v19, 0.0  ;;  %v982_v23 = vadd.f32 %v981_v21, %v813_v20 }
 0x13c   : > { %v1212_v24 = vpack.c.bf16 %v1148_v22, %v1148_v22  ;;  %v1117_v25 = vmax.f32 %v982_v23, 0.0 }
 0x13d   : > { %v892_v26 = vpop.f32.mrf.mxu2 }
 0x13e   : > { %1277 = vst.msk [vmem:[%s2201_s12 + $0xbc] sm:$0xf] %vm1229_vm0, %v1212_v24  ;;  %v1181_v27 = vpack.c.bf16 %v1117_v25, %v1117_v25  ;;  %v893_v28 = vadd.f32 %v2187_v48, %v892_v26  ;;  %v1061_v29 = vpop.f32.mrf.mxu3 }
 0x13f   : > { %v814_v30 = vpop.f32.mrf.mxu0 }
 0x140   : > { %1246 = vst.msk [vmem:[%s2201_s12 + $0x40] sm:$0xf] %vm1229_vm0, %v1181_v27  ;;  %v1062_v31 = vadd.f32 %v1061_v29, %v893_v28  ;;  %v815_v32 = vadd.f32 %v2187_v48, %v814_v30  ;;  %v983_v33 = vpop.f32.mrf.mxu1 }
 0x142   : > { %v1149_v34 = vmax.f32 %v1062_v31, 0.0  ;;  %v984_v35 = vadd.f32 %v983_v33, %v815_v32 }
 0x144   : > { %v1213_v36 = vpack.c.bf16 %v1149_v34, %v1149_v34  ;;  %v1118_v37 = vmax.f32 %v984_v35, 0.0 }
 0x145   : > { %v894_v38 = vpop.f32.mrf.mxu2 }
 0x146   : > { %1278 = vst.msk [vmem:[%s2201_s12 + $0xc0] sm:$0xf] %vm1229_vm0, %v1213_v36  ;;  %v1182_v39 = vpack.c.bf16 %v1118_v37, %v1118_v37  ;;  %v895_v40 = vadd.f32 %v2187_v48, %v894_v38  ;;  %v1063_v41 = vpop.f32.mrf.mxu3 }
 0x147   : > { %v817_v42 = vpop.f32.mrf.mxu0 }
 0x148   : > { %1247 = vst.msk [vmem:[%s2201_s12 + $0x44] sm:$0xf] %vm1229_vm0, %v1182_v39  ;;  %v1064_v43 = vadd.f32 %v1063_v41, %v895_v40  ;;  %v818_v44 = vadd.f32 %v2187_v48, %v817_v42  ;;  %v986_v45 = vpop.f32.mrf.mxu1 }
 0x14a   : > { %v1150_v46 = vmax.f32 %v1064_v43, 0.0  ;;  %v987_v47 = vadd.f32 %v986_v45, %v818_v44 }
 0x14c   : > { %v1214_v49 = vpack.c.bf16 %v1150_v46, %v1150_v46  ;;  %v1119_v50 = vmax.f32 %v987_v47, 0.0 }
 0x14d   : > { %v897_v51 = vpop.f32.mrf.mxu2 }
 0x14e   : > { %1279 = vst.msk [vmem:[%s2201_s12 + $0xc4] sm:$0xf] %vm1229_vm0, %v1214_v49  ;;  %v1183_v52 = vpack.c.bf16 %v1119_v50, %v1119_v50  ;;  %v898_v53 = vadd.f32 %v2187_v48, %v897_v51  ;;  %v1066_v54 = vpop.f32.mrf.mxu3 }
 0x14f   : > { %v819_v55 = vpop.f32.mrf.mxu0 }
 0x150   : > { %1248 = vst.msk [vmem:[%s2201_s12 + $0x48] sm:$0xf] %vm1229_vm0, %v1183_v52  ;;  %v1067_v56 = vadd.f32 %v1066_v54, %v898_v53  ;;  %v820_v57 = vadd.f32 %v2187_v48, %v819_v55  ;;  %v988_v58 = vpop.f32.mrf.mxu1 }
 0x152   : > { %v1151_v59 = vmax.f32 %v1067_v56, 0.0  ;;  %v989_v60 = vadd.f32 %v988_v58, %v820_v57 }
 0x154   : > { %v1215_v61 = vpack.c.bf16 %v1151_v59, %v1151_v59  ;;  %v1120_v62 = vmax.f32 %v989_v60, 0.0 }
 0x155   : > { %v899_v63 = vpop.f32.mrf.mxu2 }
 0x156   : > { %1280 = vst.msk [vmem:[%s2201_s12 + $0xc8] sm:$0xf] %vm1229_vm0, %v1215_v61  ;;  %v1184_v0 = vpack.c.bf16 %v1120_v62, %v1120_v62  ;;  %v900_v1 = vadd.f32 %v2187_v48, %v899_v63  ;;  %v1068_v2 = vpop.f32.mrf.mxu3 }
 0x157   : > { %v822_v3 = vpop.f32.mrf.mxu0 }
 0x158   : > { %1249 = vst.msk [vmem:[%s2201_s12 + $0x4c] sm:$0xf] %vm1229_vm0, %v1184_v0  ;;  %v1069_v4 = vadd.f32 %v1068_v2, %v900_v1  ;;  %v823_v5 = vadd.f32 %v2187_v48, %v822_v3  ;;  %v991_v6 = vpop.f32.mrf.mxu1 }
 0x15a   : > { %v1152_v7 = vmax.f32 %v1069_v4, 0.0  ;;  %v992_v8 = vadd.f32 %v991_v6, %v823_v5 }
 0x15c   : > { %v1216_v9 = vpack.c.bf16 %v1152_v7, %v1152_v7  ;;  %v1121_v10 = vmax.f32 %v992_v8, 0.0 }
 0x15d   : > { %v902_v11 = vpop.f32.mrf.mxu2 }
 0x15e   : > { %1281 = vst.msk [vmem:[%s2201_s12 + $0xcc] sm:$0xf] %vm1229_vm0, %v1216_v9  ;;  %v1185_v12 = vpack.c.bf16 %v1121_v10, %v1121_v10  ;;  %v903_v13 = vadd.f32 %v2187_v48, %v902_v11  ;;  %v1071_v14 = vpop.f32.mrf.mxu3 }
 0x15f   : > { %v824_v15 = vpop.f32.mrf.mxu0 }
 0x160   : > { %1250 = vst.msk [vmem:[%s2201_s12 + $0x50] sm:$0xf] %vm1229_vm0, %v1185_v12  ;;  %v1072_v16 = vadd.f32 %v1071_v14, %v903_v13  ;;  %v825_v17 = vadd.f32 %v2187_v48, %v824_v15  ;;  %v993_v18 = vpop.f32.mrf.mxu1 }
 0x162   : > { %v1153_v19 = vmax.f32 %v1072_v16, 0.0  ;;  %v994_v20 = vadd.f32 %v993_v18, %v825_v17 }
 0x164   : > { %v1217_v21 = vpack.c.bf16 %v1153_v19, %v1153_v19  ;;  %v1122_v22 = vmax.f32 %v994_v20, 0.0 }
 0x165   : > { %v904_v23 = vpop.f32.mrf.mxu2 }
 0x166   : > { %1282 = vst.msk [vmem:[%s2201_s12 + $0xd0] sm:$0xf] %vm1229_vm0, %v1217_v21  ;;  %v1186_v24 = vpack.c.bf16 %v1122_v22, %v1122_v22  ;;  %v905_v25 = vadd.f32 %v2187_v48, %v904_v23  ;;  %v1073_v26 = vpop.f32.mrf.mxu3 }
 0x167   : > { %v827_v27 = vpop.f32.mrf.mxu0 }
 0x168   : > { %1251 = vst.msk [vmem:[%s2201_s12 + $0x54] sm:$0xf] %vm1229_vm0, %v1186_v24  ;;  %v1074_v28 = vadd.f32 %v1073_v26, %v905_v25  ;;  %v828_v29 = vadd.f32 %v2187_v48, %v827_v27  ;;  %v996_v30 = vpop.f32.mrf.mxu1 }
 0x16a   : > { %v1154_v31 = vmax.f32 %v1074_v28, 0.0  ;;  %v997_v32 = vadd.f32 %v996_v30, %v828_v29 }
 0x16c   : > { %v1218_v33 = vpack.c.bf16 %v1154_v31, %v1154_v31  ;;  %v1123_v34 = vmax.f32 %v997_v32, 0.0 }
 0x16d   : > { %v907_v35 = vpop.f32.mrf.mxu2 }
 0x16e   : > { %1283 = vst.msk [vmem:[%s2201_s12 + $0xd4] sm:$0xf] %vm1229_vm0, %v1218_v33  ;;  %v1187_v36 = vpack.c.bf16 %v1123_v34, %v1123_v34  ;;  %v908_v37 = vadd.f32 %v2187_v48, %v907_v35  ;;  %v1076_v38 = vpop.f32.mrf.mxu3  ;;  %v1899_v34 = vld [vmem:[%s2464_s2] ss:$0 sm:$0xff] }
 0x16f   : > { %v829_v39 = vpop.f32.mrf.mxu0 }
 0x170   : > { %1252 = vst.msk [vmem:[%s2201_s12 + $0x58] sm:$0xf] %vm1229_vm0, %v1187_v36  ;;  %v1077_v40 = vadd.f32 %v1076_v38, %v908_v37  ;;  %v830_v41 = vadd.f32 %v2187_v48, %v829_v39  ;;  %v998_v42 = vpop.f32.mrf.mxu1 }
 0x172   : > { %v1155_v43 = vmax.f32 %v1077_v40, 0.0  ;;  %v999_v44 = vadd.f32 %v998_v42, %v830_v41 }
 0x174   : > { %v1219_v45 = vpack.c.bf16 %v1155_v43, %v1155_v43  ;;  %v1124_v46 = vmax.f32 %v999_v44, 0.0 }
 0x175   : > { %v909_v47 = vpop.f32.mrf.mxu2 }
 0x176   : > { %1284 = vst.msk [vmem:[%s2201_s12 + $0xd8] sm:$0xf] %vm1229_vm0, %v1219_v45  ;;  %v1188_v49 = vpack.c.bf16 %v1124_v46, %v1124_v46  ;;  %v910_v50 = vadd.f32 %v2187_v48, %v909_v47  ;;  %v1078_v51 = vpop.f32.mrf.mxu3 }
 0x177   : > { %v832_v52 = vpop.f32.mrf.mxu0 }
 0x178   : > { %1253 = vst.msk [vmem:[%s2201_s12 + $0x5c] sm:$0xf] %vm1229_vm0, %v1188_v49  ;;  %v1079_v53 = vadd.f32 %v1078_v51, %v910_v50  ;;  %v833_v54 = vadd.f32 %v2187_v48, %v832_v52  ;;  %v1001_v55 = vpop.f32.mrf.mxu1 }
 0x17a   : > { %v1156_v56 = vmax.f32 %v1079_v53, 0.0  ;;  %v1002_v57 = vadd.f32 %v1001_v55, %v833_v54 }
 0x17c   : > { %v1220_v58 = vpack.c.bf16 %v1156_v56, %v1156_v56  ;;  %v1125_v59 = vmax.f32 %v1002_v57, 0.0 }
 0x17d   : > { %v912_v60 = vpop.f32.mrf.mxu2 }
 0x17e   : > { %1285 = vst.msk [vmem:[%s2201_s12 + $0xdc] sm:$0xf] %vm1229_vm0, %v1220_v58  ;;  %v1189_v61 = vpack.c.bf16 %v1125_v59, %v1125_v59  ;;  %v913_v62 = vadd.f32 %v2187_v48, %v912_v60  ;;  %v1081_v63 = vpop.f32.mrf.mxu3 }
 0x17f   : > { %v834_v0 = vpop.f32.mrf.mxu0 }
 0x180   : > { %1254 = vst.msk [vmem:[%s2201_s12 + $0x60] sm:$0xf] %vm1229_vm0, %v1189_v61  ;;  %v1082_v1 = vadd.f32 %v1081_v63, %v913_v62  ;;  %v835_v2 = vadd.f32 %v2187_v48, %v834_v0  ;;  %v1003_v3 = vpop.f32.mrf.mxu1 }
 0x182   : > { %v1157_v4 = vmax.f32 %v1082_v1, 0.0  ;;  %v1004_v5 = vadd.f32 %v1003_v3, %v835_v2 }
 0x184   : > { %v1221_v6 = vpack.c.bf16 %v1157_v4, %v1157_v4  ;;  %v1126_v7 = vmax.f32 %v1004_v5, 0.0 }
 0x185   : > { %v914_v8 = vpop.f32.mrf.mxu2 }
 0x186   : > { %1286 = vst.msk [vmem:[%s2201_s12 + $0xe0] sm:$0xf] %vm1229_vm0, %v1221_v6  ;;  %v1190_v9 = vpack.c.bf16 %v1126_v7, %v1126_v7  ;;  %v915_v10 = vadd.f32 %v2187_v48, %v914_v8  ;;  %v1083_v11 = vpop.f32.mrf.mxu3 }
 0x187   : > { %v837_v12 = vpop.f32.mrf.mxu0 }
 0x188   : > { %1255 = vst.msk [vmem:[%s2201_s12 + $0x64] sm:$0xf] %vm1229_vm0, %v1190_v9  ;;  %v1084_v13 = vadd.f32 %v1083_v11, %v915_v10  ;;  %v838_v14 = vadd.f32 %v2187_v48, %v837_v12  ;;  %v1006_v15 = vpop.f32.mrf.mxu1 }
 0x18a   : > { %v1158_v16 = vmax.f32 %v1084_v13, 0.0  ;;  %v1007_v17 = vadd.f32 %v1006_v15, %v838_v14 }
 0x18c   : > { %v1222_v18 = vpack.c.bf16 %v1158_v16, %v1158_v16  ;;  %v1127_v19 = vmax.f32 %v1007_v17, 0.0 }
 0x18d   : > { %v917_v20 = vpop.f32.mrf.mxu2 }
 0x18e   : > { %1287 = vst.msk [vmem:[%s2201_s12 + $0xe4] sm:$0xf] %vm1229_vm0, %v1222_v18  ;;  %v1191_v21 = vpack.c.bf16 %v1127_v19, %v1127_v19  ;;  %v918_v22 = vadd.f32 %v2187_v48, %v917_v20  ;;  %v1086_v23 = vpop.f32.mrf.mxu3 }
 0x18f   : > { %v839_v24 = vpop.f32.mrf.mxu0 }
 0x190   : > { %1256 = vst.msk [vmem:[%s2201_s12 + $0x68] sm:$0xf] %vm1229_vm0, %v1191_v21  ;;  %v1087_v25 = vadd.f32 %v1086_v23, %v918_v22  ;;  %v840_v26 = vadd.f32 %v2187_v48, %v839_v24  ;;  %v1008_v27 = vpop.f32.mrf.mxu1 }
 0x192   : > { %v1159_v28 = vmax.f32 %v1087_v25, 0.0  ;;  %v1009_v29 = vadd.f32 %v1008_v27, %v840_v26 }
 0x194   : > { %v1223_v30 = vpack.c.bf16 %v1159_v28, %v1159_v28  ;;  %v1128_v31 = vmax.f32 %v1009_v29, 0.0 }
 0x195   : > { %v919_v32 = vpop.f32.mrf.mxu2 }
 0x196   : > { %1288 = vst.msk [vmem:[%s2201_s12 + $0xe8] sm:$0xf] %vm1229_vm0, %v1223_v30  ;;  %v1192_v33 = vpack.c.bf16 %v1128_v31, %v1128_v31  ;;  %v920_v35 = vadd.f32 %v1899_v34, %v919_v32  ;;  %v1088_v36 = vpop.f32.mrf.mxu3 }
 0x197   : > { %v842_v37 = vpop.f32.mrf.mxu0 }
 0x198   : > { %1257 = vst.msk [vmem:[%s2201_s12 + $0x6c] sm:$0xf] %vm1229_vm0, %v1192_v33  ;;  %v1089_v48 = vadd.f32 %v1088_v36, %v920_v35  ;;  %v843_v38 = vadd.f32 %v1899_v34, %v842_v37  ;;  %v1011_v39 = vpop.f32.mrf.mxu1 }
 0x19a   : > { %v1160_v40 = vmax.f32 %v1089_v48, 0.0  ;;  %v1012_v41 = vadd.f32 %v1011_v39, %v843_v38 }
 0x19c   : > { %v1224_v42 = vpack.c.bf16 %v1160_v40, %v1160_v40  ;;  %v1129_v43 = vmax.f32 %v1012_v41, 0.0 }
 0x19d   : > { %v922_v44 = vpop.f32.mrf.mxu2 }
 0x19e   : > { %1289 = vst.msk [vmem:[%s2201_s12 + $0xec] sm:$0xf] %vm1229_vm0, %v1224_v42  ;;  %v1193_v45 = vpack.c.bf16 %v1129_v43, %v1129_v43  ;;  %v923_v46 = vadd.f32 %v1899_v34, %v922_v44  ;;  %v1091_v47 = vpop.f32.mrf.mxu3 }
 0x19f   : > { %v844_v49 = vpop.f32.mrf.mxu0 }
 0x1a0   : > { %1258 = vst.msk [vmem:[%s2201_s12 + $0x70] sm:$0xf] %vm1229_vm0, %v1193_v45  ;;  %v1092_v50 = vadd.f32 %v1091_v47, %v923_v46  ;;  %v845_v51 = vadd.f32 %v1899_v34, %v844_v49  ;;  %v1013_v52 = vpop.f32.mrf.mxu1 }
 0x1a2   : > { %v1161_v53 = vmax.f32 %v1092_v50, 0.0  ;;  %v1014_v54 = vadd.f32 %v1013_v52, %v845_v51 }
 0x1a4   : > { %v1225_v55 = vpack.c.bf16 %v1161_v53, %v1161_v53  ;;  %v1130_v56 = vmax.f32 %v1014_v54, 0.0 }
 0x1a5   : > { %v924_v57 = vpop.f32.mrf.mxu2 }
 0x1a6   : > { %1290 = vst.msk [vmem:[%s2201_s12 + $0xf0] sm:$0xf] %vm1229_vm0, %v1225_v55  ;;  %v1194_v58 = vpack.c.bf16 %v1130_v56, %v1130_v56  ;;  %v925_v59 = vadd.f32 %v1899_v34, %v924_v57  ;;  %v1093_v60 = vpop.f32.mrf.mxu3 }
 0x1a7   : > { %v847_v61 = vpop.f32.mrf.mxu0 }
 0x1a8   : > { %1259 = vst.msk [vmem:[%s2201_s12 + $0x74] sm:$0xf] %vm1229_vm0, %v1194_v58  ;;  %v1094_v62 = vadd.f32 %v1093_v60, %v925_v59  ;;  %v848_v63 = vadd.f32 %v1899_v34, %v847_v61  ;;  %v1016_v0 = vpop.f32.mrf.mxu1 }
 0x1aa   : > { %v1162_v1 = vmax.f32 %v1094_v62, 0.0  ;;  %v1017_v2 = vadd.f32 %v1016_v0, %v848_v63 }
 0x1ac   : > { %v1226_v3 = vpack.c.bf16 %v1162_v1, %v1162_v1  ;;  %v1131_v4 = vmax.f32 %v1017_v2, 0.0 }
 0x1ad   : > { %v927_v5 = vpop.f32.mrf.mxu2 }
 0x1ae   : > { %1291 = vst.msk [vmem:[%s2201_s12 + $0xf4] sm:$0xf] %vm1229_vm0, %v1226_v3  ;;  %v1195_v6 = vpack.c.bf16 %v1131_v4, %v1131_v4  ;;  %v928_v7 = vadd.f32 %v1899_v34, %v927_v5  ;;  %v1096_v8 = vpop.f32.mrf.mxu3 }
 0x1af   : > { %v849_v9 = vpop.f32.mrf.mxu0 }
 0x1b0   : > { %1260 = vst.msk [vmem:[%s2201_s12 + $0x78] sm:$0xf] %vm1229_vm0, %v1195_v6  ;;  %v1097_v10 = vadd.f32 %v1096_v8, %v928_v7  ;;  %v850_v11 = vadd.f32 %v1899_v34, %v849_v9  ;;  %v1018_v12 = vpop.f32.mrf.mxu1 }
 0x1b2   : > { %v1163_v13 = vmax.f32 %v1097_v10, 0.0  ;;  %v1019_v14 = vadd.f32 %v1018_v12, %v850_v11 }
 0x1b4   : > { %v1227_v15 = vpack.c.bf16 %v1163_v13, %v1163_v13  ;;  %v1132_v16 = vmax.f32 %v1019_v14, 0.0 }
 0x1b5   : > { %v929_v17 = vpop.f32.mrf.mxu2 }
 0x1b6   : > { %1292 = vst.msk [vmem:[%s2201_s12 + $0xf8] sm:$0xf] %vm1229_vm0, %v1227_v15  ;;  %v1196_v18 = vpack.c.bf16 %v1132_v16, %v1132_v16  ;;  %v930_v19 = vadd.f32 %v1899_v34, %v929_v17  ;;  %v1098_v20 = vpop.f32.mrf.mxu3 }
 0x1b8   : > { %1261 = vst.msk [vmem:[%s2201_s12 + $0x7c] sm:$0xf] %vm1229_vm0, %v1196_v18  ;;  %v1099_v21 = vadd.f32 %v1098_v20, %v930_v19 }
 0x1ba   : > { %v1164_v22 = vmax.f32 %v1099_v21, 0.0 }
 0x1bc   : > { %v1228_v23 = vpack.c.bf16 %v1164_v22, %v1164_v22 }
 0x1be   : > { %1293 = vst.msk [vmem:[%s2201_s12 + $0xfc] sm:$0xf] %vm1229_vm0, %v1228_v23 }
 0x1bf PF: > { %s16_s17 = sadd.s32 1, %s1980_s17   ;;  %s2468_s12 = smov %s1964_s13 }
 0x1c0   : > { %p13_p0 = scmp.ge.s32.totalorder %s16_s17, 6   ;;  %s2469_s13 = smov %s1968_s14 }
 0x1c1   : > { %s2470_s14 = smov %s2053_s24  ;;  %s2471_s15 = smov %s1976_s16 }
 0x1c2   : > { %s2472_s16 = smov %s2474_s19  ;;  %15 = sbr.rel (!%p13_p0) target bundleno = 4 (0x4), region = 78 }
 0x1c7   :  { %1322 = vsyncpa [#allocation3], 1 }
 0x1c8   :  { %1324 = vsyncpa [#allocation3 + $0x1], 1 }

</bundles_post_ra>
